<compile_context>
chip_gen: v5e
topology: v5e:2x2
jax: 0.10.0
libtpu: 0.0.40
codegen_flags: <defaults>
</compile_context>

<pallas_src>
import functools

import jax
import jax.numpy as jnp
from jax.experimental import pallas as pl
from jax.experimental.pallas import tpu as pltpu

BN_EPS = 1e-05
STRIDE_1X1 = False


def _ru(x, m):
    return (x + m - 1) // m * m


def _vmem_budget_bytes():
    # Per-generation awareness: v5e/v6e have 128 MiB physical VMEM, v7x 64 MiB.
    try:
        cap = int(pltpu.get_tpu_info().vmem_capacity_bytes)
    except Exception:  # pragma: no cover - CPU tracing / older jax: be conservative.
        cap = 64 << 20
    return int(min(cap // 3, 40 << 20))


def _compiler_params(est_bytes, semantics):
    limit = int(min(64 << 20, max(32 << 20, 2 * int(est_bytes))))
    return pltpu.CompilerParams(dimension_semantics=semantics,
                                vmem_limit_bytes=limit)


def _bn_fold(gamma, beta, mean, var):
    scale = gamma / jnp.sqrt(var + BN_EPS)
    bias = beta - mean * scale
    return scale.astype(jnp.float32), bias.astype(jnp.float32)


# --------------------- Kernel A: 1x1 conv + BN + relup ------------------------

def _mm_bias_act_kernel(x_ref, w_ref, b_ref, o_ref, *, alpha, apply_act):
    y = jnp.dot(x_ref[...], w_ref[...], preferred_element_type=jnp.float32)
    y = y + b_ref[...]
    if apply_act:
        y = jnp.maximum(y, jnp.float32(alpha))
    o_ref[...] = y.astype(o_ref.dtype)


def _fused_matmul_bias_act(x2d, wmat, bias, *, alpha, apply_act, out_dtype):
    """y = x2d @ wmat + bias (+clamp).  BN scale must already be folded into wmat."""
    M, K = x2d.shape
    K2, C = wmat.shape
    assert K == K2 and K % 128 == 0 and C % 128 == 0
    out_b = jnp.dtype(out_dtype).itemsize

    budget = _vmem_budget_bytes()

    def est(tm):
        return (2 * tm * K * 2 + 2 * tm * C * out_b      # pipelined act / out blocks
                + 2 * K * C * 2 + 2 * C * 4              # resident weights / bias
                + 4 * tm * C)                            # f32 temporaries

    tm = 1024
    while tm > 128 and est(tm) > budget:
        tm //= 2
    if tm >= M:
        tm = M  # one full block is always a legal block shape

    cost = pl.CostEstimate(
        flops=2 * M * K * C, transcendentals=0,
        bytes_accessed=M * K * 2 + K * C * 2 + C * 4 + M * C * out_b)

    return pl.pallas_call(
        functools.partial(_mm_bias_act_kernel, alpha=alpha, apply_act=apply_act),
        out_shape=jax.ShapeDtypeStruct((M, C), out_dtype),
        grid_spec=pltpu.PrefetchScalarGridSpec(
            num_scalar_prefetch=0,
            grid=(pl.cdiv(M, tm),),
            in_specs=[
                pl.BlockSpec((tm, K), lambda i: (i, 0)),   # activations, pipelined
                pl.BlockSpec((K, C), lambda i: (0, 0)),    # scaled weights, resident
                pl.BlockSpec((1, C), lambda i: (0, 0)),    # BN bias, resident
            ],
            out_specs=pl.BlockSpec((tm, C), lambda i: (i, 0)),
        ),
        compiler_params=_compiler_params(est(tm), ("parallel",)),
        cost_estimate=cost,
    )(x2d, wmat, bias)


# ----- Kernel B: 3x3 grouped conv + BN + relup + 1x1 conv_c + BN (fused) ------

def _conv3x3_c_kernel(*refs, num_taps, tap_plan, alpha, th, wo, cbp):
    tap_refs = refs[:num_taps]
    wb_ref, bb_ref, wc_ref, bc_ref, o_ref = refs[num_taps:]

    acc = None
    for t in range(9):                                    # static unroll, 9 MXU dots
        src, off = tap_plan[t]
        patch = tap_refs[src][:, off:off + wo, :]         # (th, wo, cbp)
        patch = patch.reshape(th * wo, cbp)
        part = jnp.dot(patch, wb_ref[t], preferred_element_type=jnp.float32)
        acc = part if acc is None else acc + part
    y = jnp.maximum(acc + bb_ref[...], jnp.float32(alpha))   # BN_b bias + relup
    z = jnp.dot(y.astype(jnp.bfloat16), wc_ref[...],
                preferred_element_type=jnp.float32)           # fused conv_c
    o_ref[...] = (z + bc_ref[...]).astype(o_ref.dtype)        # BN_c bias


def _build_tap_inputs(x1, stride):
    """3x3/pad=1/stride-s tap views of the channel-padded activation.

    Returns (tap tensors [N,Ho,Wt,Cp], plan of (tensor_idx, col_offset) per tap,
    Ho, Wo).  Materializes only ~3x (stride 1) / ~1.5x (stride 2) of the
    activation bytes instead of the 9x a full im2col would.
    """
    N, H, W, _ = x1.shape
    Ho = (H - 1) // stride + 1
    Wo = (W - 1) // stride + 1
    if stride == 1:
        xp = jnp.pad(x1, ((0, 0), (1, 1), (1, 1), (0, 0)))
        taps = [xp[:, kh:kh + Ho, :, :] for kh in range(3)]           # width W+2
        plan = tuple((kh, kw) for kh in range(3) for kw in range(3))
    elif stride == 2:
        extra = (2 * Wo + 2) - (W + 2)
        xp = jnp.pad(x1, ((0, 0), (1, 1), (1, 1 + extra), (0, 0)))    # width 2*Wo+2
        taps = []
        for kh in range(3):
            rows = xp[:, kh:kh + 2 * (Ho - 1) + 1:2, :, :]            # (N,Ho,2Wo+2,C)
            taps.append(rows[:, :, 0::2, :])                          # even columns
            taps.append(rows[:, :, 1::2, :])                          # odd columns
        plan = tuple((2 * kh + (kw % 2), kw // 2)
                     for kh in range(3) for kw in range(3))
    else:
        # TODO(synk): strides > 2 would need an s-phase decomposition (unused by CVNet).
        raise NotImplementedError("stride must be 1 or 2")
    return taps, plan, Ho, Wo


def _fused_conv3x3_bn_act_conv1x1_bn(x1, wb_dense9, bias_b, wc_mat, bias_c, *,
                                     stride, alpha, out_dtype):
    N, _, _, Cbp = x1.shape
    Coutp = wc_mat.shape[1]
    taps, plan, Ho, Wo = _build_tap_inputs(x1, stride)
    T = len(taps)
    Wt = taps[0].shape[2]
    out_b = jnp.dtype(out_dtype).itemsize
    budget = _vmem_budget_bytes()

    def est_bytes(th):
        return (2 * T * th * Wt * Cbp * 2          # tap blocks, double buffered
                + 2 * th * Wo * Coutp * out_b      # output block, double buffered
                + 2 * 9 * Cbp * Cbp * 2            # resident block-diag 3x3 weights
                + 2 * Cbp * Coutp * 2              # resident conv_c weights
                + 4 * (Cbp + Coutp) * 4            # biases
                + th * Wo * (Cbp + Coutp) * 4)     # in-kernel f32 temporaries

    # Row-tile: largest divisor of Ho that keeps the working set in the VMEM budget
    # and keeps the (th*Wo, Coutp) output block 8-sublane aligned (lane-dense vst).
    valid = [t for t in range(1, Ho + 1)
             if Ho % t == 0 and ((t * Wo) % 8 == 0 or t == Ho)]
    fits = [t for t in valid if t * Wo <= 1024 and est_bytes(t) <= budget]
    th = max(fits) if fits else min(valid)

    M2 = N * Ho * Wo
    cost = pl.CostEstimate(
        flops=2 * M2 * Cbp * (9 * Cbp + Coutp),
        transcendentals=0,
        bytes_accessed=(sum(int(t.size) for t in taps) * 2
                        + 9 * Cbp * Cbp * 2 + Cbp * Coutp * 2
                        + M2 * Coutp * out_b))

    tap_specs = [pl.BlockSpec((None, th, Wt, Cbp), lambda n, i: (n, i, 0, 0))
                 for _ in range(T)]
    in_specs = tap_specs + [
        pl.BlockSpec((9, Cbp, Cbp), lambda n, i: (0, 0, 0)),   # resident b-weights
        pl.BlockSpec((1, Cbp), lambda n, i: (0, 0)),           # resident BN_b bias
        pl.BlockSpec((Cbp, Coutp), lambda n, i: (0, 0)),       # resident c-weights
        pl.BlockSpec((1, Coutp), lambda n, i: (0, 0)),         # resident BN_c bias
    ]

    out2d = pl.pallas_call(
        functools.partial(_conv3x3_c_kernel, num_taps=T, tap_plan=plan,
                          alpha=alpha, th=th, wo=Wo, cbp=Cbp),
        out_shape=jax.ShapeDtypeStruct((N, Ho * Wo, Coutp), out_dtype),
        grid_spec=pltpu.PrefetchScalarGridSpec(
            num_scalar_prefetch=0,
            grid=(N, Ho // th),
            in_specs=in_specs,
            out_specs=pl.BlockSpec((None, th * Wo, Coutp), lambda n, i: (n, i, 0)),
        ),
        compiler_params=_compiler_params(est_bytes(th), ("parallel", "parallel")),
        cost_estimate=cost,
    )(*taps, wb_dense9, bias_b, wc_mat, bias_c)
    return out2d.reshape(N, Ho, Wo, Coutp)


# ------------------------------- JAX glue -------------------------------------

def bottleneck_transform_forward(x_nchw, params, *, stride, num_gs, w_out,
                                 relup_, final_dtype=jnp.float32):
    """BottleneckTransform forward: 1x1-BN-relup, 3x3-BN-relup, 1x1-BN (NCHW)."""
    alpha = 0.014 if (w_out == 256 and relup_) else 0.0
    s1, s3 = (stride, 1) if STRIDE_1X1 else (1, stride)

    w_b, w_in = params["a_w"].shape[0], params["a_w"].shape[1]
    Cinp, Cbp, Coutp = _ru(w_in, 128), _ru(w_b, 128), _ru(w_out, 128)

    x = jnp.transpose(x_nchw, (0, 2, 3, 1))               # NCHW -> NHWC
    if s1 > 1:                                            # 1x1 conv stride == subsample
        x = x[:, ::s1, ::s1, :]
    N, H, W, _ = x.shape

    # ---- conv_a (1x1) + BN + relup ------------------------------------------
    scale_a, bias_a = _bn_fold(params["a_gamma"], params["a_beta"],
                               params["a_mean"], params["a_var"])
    wa = jnp.transpose(params["a_w"][:, :, 0, 0], (1, 0)) * scale_a[None, :]
    wa = jnp.pad(wa, ((0, Cinp - w_in), (0, Cbp - w_b))).astype(jnp.bfloat16)
    ba = jnp.pad(bias_a.reshape(1, w_b), ((0, 0), (0, Cbp - w_b)))
    x2d = jnp.pad(x.reshape(N * H * W, w_in),
                  ((0, 0), (0, Cinp - w_in))).astype(jnp.bfloat16)
    x1 = _fused_matmul_bias_act(x2d, wa, ba, alpha=alpha, apply_act=True,
                                out_dtype=jnp.bfloat16)    # (N*H*W, Cbp), bf16
    x1 = x1.reshape(N, H, W, Cbp)      # channel-padded layout carried to stage b/c

    # ---- conv_b (3x3 grouped) + BN + relup + conv_c (1x1) + BN --------------
    scale_b, bias_b = _bn_fold(params["b_gamma"], params["b_beta"],
                               params["b_mean"], params["b_var"])
    scale_c, bias_c = _bn_fold(params["c_gamma"], params["c_beta"],
                               params["c_mean"], params["c_var"])

    G = num_gs
    cin_g = w_b // G
    cout_g = w_b // G
    wb_r = params["b_w"].reshape(G, cout_g, cin_g, 3, 3)
    blocks = jnp.transpose(wb_r, (3, 4, 0, 2, 1)).reshape(9, G, cin_g, cout_g)
    dense = jnp.zeros((9, w_b, w_b), jnp.float32)
    for g in range(G):      # groups folded as block-diagonal taps -> single launch
        dense = dense.at[:, g * cin_g:(g + 1) * cin_g,
                         g * cout_g:(g + 1) * cout_g].set(blocks[:, g])
    dense = dense * scale_b[None, None, :]                       # fold BN_b scale
    wb_dense9 = jnp.pad(dense, ((0, 0), (0, Cbp - w_b),
                                (0, Cbp - w_b))).astype(jnp.bfloat16)
    bb = jnp.pad(bias_b.reshape(1, w_b), ((0, 0), (0, Cbp - w_b)))

    wc = jnp.transpose(params["c_w"][:, :, 0, 0], (1, 0)) * scale_c[None, :]
    wc = jnp.pad(wc, ((0, Cbp - w_b), (0, Coutp - w_out))).astype(jnp.bfloat16)
    bc = jnp.pad(bias_c.reshape(1, w_out), ((0, 0), (0, Coutp - w_out)))

    out = _fused_conv3x3_bn_act_conv1x1_bn(
        x1, wb_dense9, bb, wc, bc, stride=s3, alpha=alpha, out_dtype=final_dtype)
    out = out[..., :w_out]                                 # un-pad channels once
    return jnp.transpose(out, (0, 3, 1, 2))                # NHWC -> NCHW


# --------------------------- pure-JAX reference --------------------------------

def _ref_forward(x, p, *, stride, num_gs, w_out, relup_):
    alpha = 0.014 if (w_out == 256 and relup_) else 0.0
    s1, s3 = (stride, 1) if STRIDE_1X1 else (1, stride)

    def conv(x, w, s, pad, groups=1):
        return jax.lax.conv_general_dilated(
            x, w, window_strides=(s, s), padding=((pad, pad), (pad, pad)),
            dimension_numbers=("NCHW", "OIHW", "NCHW"),
            feature_group_count=groups)

    def bn(x, g, b, m, v):
        g = g.reshape(1, -1, 1, 1); b = b.reshape(1, -1, 1, 1)
        m = m.reshape(1, -1, 1, 1); v = v.reshape(1, -1, 1, 1)
        return (x - m) / jnp.sqrt(v + BN_EPS) * g + b

    x = conv(x, p["a_w"], s1, 0)
    x = bn(x, p["a_gamma"], p["a_beta"], p["a_mean"], p["a_var"])
    x = jnp.maximum(x, alpha)
    x = conv(x, p["b_w"], s3, 1, groups=num_gs)
    x = bn(x, p["b_gamma"], p["b_beta"], p["b_mean"], p["b_var"])
    x = jnp.maximum(x, alpha)
    x = conv(x, p["c_w"], 1, 0)
    x = bn(x, p["c_gamma"], p["c_beta"], p["c_mean"], p["c_var"])
    return x


# --------------------------------- main ----------------------------------------

if __name__ == "__main__":
    # Small shapes consistent with the module: w_in=4, w_b=4, w_out=8, stride=2.
    N, W_IN, W_B, W_OUT, NUM_GS, H, W, STRIDE = 2, 4, 4, 8, 2, 16, 16, 2
    RELUP = False

    key = jax.random.PRNGKey(0)
    ks = jax.random.split(key, 16)

    params = {
        "a_w": 0.1 * jax.random.normal(ks[0], (W_B, W_IN, 1, 1), jnp.float32),
        "b_w": 0.1 * jax.random.normal(ks[1], (W_B, W_B // NUM_GS, 3, 3), jnp.float32),
        "c_w": 0.1 * jax.random.normal(ks[2], (W_OUT, W_B, 1, 1), jnp.float32),
    }
    for name, c, k0 in (("a", W_B, 3), ("b", W_B, 7), ("c", W_OUT, 11)):
        params[f"{name}_gamma"] = 1.0 + 0.1 * jax.random.normal(ks[k0], (c,), jnp.float32)
        params[f"{name}_beta"] = 0.1 * jax.random.normal(ks[k0 + 1], (c,), jnp.float32)
        params[f"{name}_mean"] = 0.1 * jax.random.normal(ks[k0 + 2], (c,), jnp.float32)
        params[f"{name}_var"] = 0.5 + jnp.abs(jax.random.normal(ks[k0 + 3], (c,), jnp.float32))

    x = jax.random.normal(ks[15], (N, W_IN, H, W), jnp.float32)

    fwd = jax.jit(functools.partial(bottleneck_transform_forward,
                                    stride=STRIDE, num_gs=NUM_GS,
                                    w_out=W_OUT, relup_=RELUP))
    out = jax.block_until_ready(fwd(x, params))

    ref = jax.block_until_ready(
        _ref_forward(x, params, stride=STRIDE, num_gs=NUM_GS,
                     w_out=W_OUT, relup_=RELUP))

    assert out.shape == ref.shape, (out.shape, ref.shape)
    max_err = float(jnp.max(jnp.abs(out - ref)))
    # bf16 MXU operands + bf16 intermediate activation => relaxed tolerance.
    assert jnp.allclose(out, ref, atol=3e-2, rtol=3e-2), max_err

    print("KERNEL_OK")
</pallas_src>

<mosaic_0001>
module attributes {stable_mosaic.version = 11 : i64} {
  func.func @_mm_bias_act_kernel(%arg0: i32, %arg1: memref<512x128xbf16, #tpu.memory_space<vmem>>, %arg2: memref<128x128xbf16, #tpu.memory_space<vmem>>, %arg3: memref<1x128xf32, #tpu.memory_space<vmem>>, %arg4: memref<512x128xbf16, #tpu.memory_space<vmem>>) attributes {dimension_semantics = [#tpu.dimension_semantics<parallel>], iteration_bounds = array<i64: 1>, scalar_prefetch = 0 : i64, scratch_operands = 0 : i64, tpu.core_type = #tpu.core_type<tc>, window_params = [{transform_indices = @transform_0, window_bounds = array<i64: 512, 128>}, {pipeline_mode = #tpu.pipeline_mode<synchronous>, transform_indices = @transform_1, window_bounds = array<i64: 128, 128>}, {pipeline_mode = #tpu.pipeline_mode<synchronous>, transform_indices = @transform_2, window_bounds = array<i64: 1, 128>}, {transform_indices = @transform_3, window_bounds = array<i64: 512, 128>}]} {
    %c0 = arith.constant 0 : index
    %c0_0 = arith.constant 0 : index
    %0 = vector.load %arg1[%c0, %c0_0] : memref<512x128xbf16, #tpu.memory_space<vmem>>, vector<512x128xbf16>
    %c0_1 = arith.constant 0 : index
    %c0_2 = arith.constant 0 : index
    %1 = vector.load %arg2[%c0_1, %c0_2] : memref<128x128xbf16, #tpu.memory_space<vmem>>, vector<128x128xbf16>
    %cst = arith.constant dense<0.000000e+00> : vector<512x128xf32>
    %2 = tpu.matmul %0, %1, %cst {dimension_numbers = #tpu.dot_dimension_numbers<[1], [0], [0], [1], [0, 0, 1, 1], [], []>} : vector<512x128xbf16>, vector<128x128xbf16>, vector<512x128xf32> -> vector<512x128xf32>
    %c0_3 = arith.constant 0 : index
    %c0_4 = arith.constant 0 : index
    %3 = vector.load %arg3[%c0_3, %c0_4] : memref<1x128xf32, #tpu.memory_space<vmem>>, vector<1x128xf32>
    %4 = vector.broadcast %3 : vector<1x128xf32> to vector<512x128xf32>
    %5 = arith.addf %2, %4 : vector<512x128xf32>
    %cst_5 = arith.constant 0.000000e+00 : f32
    %6 = vector.broadcast %cst_5 : f32 to vector<512x128xf32>
    %7 = arith.maximumf %5, %6 : vector<512x128xf32>
    %8 = arith.truncf %7 : vector<512x128xf32> to vector<512x128xbf16>
    %c0_6 = arith.constant 0 : index
    %c0_7 = arith.constant 0 : index
    %9 = vector.load %arg4[%c0_6, %c0_7] : memref<512x128xbf16, #tpu.memory_space<vmem>>, vector<512x128xbf16>
    tpu.vector_store %arg4[%c0_6, %c0_7], %8 {strides = array<i32>} : memref<512x128xbf16, #tpu.memory_space<vmem>>, vector<512x128xbf16>,
    return
  }
  func.func @transform_0(%arg0: i32) -> (i32, i32) {
    %c0_i32 = arith.constant 0 : i32
    %c0_i32_0 = arith.constant 0 : i32
    return %arg0, %c0_i32 : i32, i32
  }
  func.func @transform_1(%arg0: i32) -> (i32, i32) {
    %c0_i32 = arith.constant 0 : i32
    %c0_i32_0 = arith.constant 0 : i32
    %c0_i32_1 = arith.constant 0 : i32
    return %c0_i32, %c0_i32_0 : i32, i32
  }
  func.func @transform_2(%arg0: i32) -> (i32, i32) {
    %c0_i32 = arith.constant 0 : i32
    %c0_i32_0 = arith.constant 0 : i32
    %c0_i32_1 = arith.constant 0 : i32
    return %c0_i32, %c0_i32_0 : i32, i32
  }
  func.func @transform_3(%arg0: i32) -> (i32, i32) {
    %c0_i32 = arith.constant 0 : i32
    %c0_i32_0 = arith.constant 0 : i32
    return %arg0, %c0_i32 : i32, i32
  }
}

module attributes {stable_mosaic.version = 11 : i64} {
  func.func @_conv3x3_c_kernel(%arg0: i32, %arg1: i32, %arg2: memref<1x8x9x128xbf16, #tpu.memory_space<vmem>>, %arg3: memref<1x8x9x128xbf16, #tpu.memory_space<vmem>>, %arg4: memref<1x8x9x128xbf16, #tpu.memory_space<vmem>>, %arg5: memref<1x8x9x128xbf16, #tpu.memory_space<vmem>>, %arg6: memref<1x8x9x128xbf16, #tpu.memory_space<vmem>>, %arg7: memref<1x8x9x128xbf16, #tpu.memory_space<vmem>>, %arg8: memref<9x128x128xbf16, #tpu.memory_space<vmem>>, %arg9: memref<1x128xf32, #tpu.memory_space<vmem>>, %arg10: memref<128x128xbf16, #tpu.memory_space<vmem>>, %arg11: memref<1x128xf32, #tpu.memory_space<vmem>>, %arg12: memref<1x64x128xf32, #tpu.memory_space<vmem>>) attributes {dimension_semantics = [#tpu.dimension_semantics<parallel>, #tpu.dimension_semantics<parallel>], iteration_bounds = array<i64: 2, 1>, scalar_prefetch = 0 : i64, scratch_operands = 0 : i64, tpu.core_type = #tpu.core_type<tc>, window_params = [{transform_indices = @transform_0, window_bounds = array<i64: 1, 8, 9, 128>}, {transform_indices = @transform_1, window_bounds = array<i64: 1, 8, 9, 128>}, {transform_indices = @transform_2, window_bounds = array<i64: 1, 8, 9, 128>}, {transform_indices = @transform_3, window_bounds = array<i64: 1, 8, 9, 128>}, {transform_indices = @transform_4, window_bounds = array<i64: 1, 8, 9, 128>}, {transform_indices = @transform_5, window_bounds = array<i64: 1, 8, 9, 128>}, {pipeline_mode = #tpu.pipeline_mode<synchronous>, transform_indices = @transform_6, window_bounds = array<i64: 9, 128, 128>}, {pipeline_mode = #tpu.pipeline_mode<synchronous>, transform_indices = @transform_7, window_bounds = array<i64: 1, 128>}, {pipeline_mode = #tpu.pipeline_mode<synchronous>, transform_indices = @transform_8, window_bounds = array<i64: 128, 128>}, {pipeline_mode = #tpu.pipeline_mode<synchronous>, transform_indices = @transform_9, window_bounds = array<i64: 1, 128>}, {transform_indices = @transform_10, window_bounds = array<i64: 1, 64, 128>}]} {
    %c0 = arith.constant 0 : index
    %c0_0 = arith.constant 0 : index
    %c0_1 = arith.constant 0 : index
    %c0_2 = arith.constant 0 : index
    %0 = vector.load %arg2[%c0, %c0_0, %c0_1, %c0_2] : memref<1x8x9x128xbf16, #tpu.memory_space<vmem>>, vector<1x8x8x128xbf16>
    %1 = vector.shape_cast %0 : vector<1x8x8x128xbf16> to vector<8x8x128xbf16>
    %2 = vector.shape_cast %1 : vector<8x8x128xbf16> to vector<64x128xbf16>
    %c0_3 = arith.constant 0 : index
    %c0_4 = arith.constant 0 : index
    %c0_5 = arith.constant 0 : index
    %3 = vector.load %arg8[%c0_3, %c0_4, %c0_5] : memref<9x128x128xbf16, #tpu.memory_space<vmem>>, vector<1x128x128xbf16>
    %4 = vector.shape_cast %3 : vector<1x128x128xbf16> to vector<128x128xbf16>
    %cst = arith.constant dense<0.000000e+00> : vector<64x128xf32>
    %5 = tpu.matmul %2, %4, %cst {dimension_numbers = #tpu.dot_dimension_numbers<[1], [0], [0], [1], [0, 0, 1, 1], [], []>} : vector<64x128xbf16>, vector<128x128xbf16>, vector<64x128xf32> -> vector<64x128xf32>
    %c0_6 = arith.constant 0 : index
    %c0_7 = arith.constant 0 : index
    %c0_8 = arith.constant 0 : index
    %c0_9 = arith.constant 0 : index
    %6 = vector.load %arg3[%c0_6, %c0_7, %c0_8, %c0_9] : memref<1x8x9x128xbf16, #tpu.memory_space<vmem>>, vector<1x8x8x128xbf16>
    %7 = vector.shape_cast %6 : vector<1x8x8x128xbf16> to vector<8x8x128xbf16>
    %8 = vector.shape_cast %7 : vector<8x8x128xbf16> to vector<64x128xbf16>
    %c1 = arith.constant 1 : index
    %c0_10 = arith.constant 0 : index
    %c0_11 = arith.constant 0 : index
    %9 = vector.load %arg8[%c1, %c0_10, %c0_11] : memref<9x128x128xbf16, #tpu.memory_space<vmem>>, vector<1x128x128xbf16>
    %10 = vector.shape_cast %9 : vector<1x128x128xbf16> to vector<128x128xbf16>
    %cst_12 = arith.constant dense<0.000000e+00> : vector<64x128xf32>
    %11 = tpu.matmul %8, %10, %cst_12 {dimension_numbers = #tpu.dot_dimension_numbers<[1], [0], [0], [1], [0, 0, 1, 1], [], []>} : vector<64x128xbf16>, vector<128x128xbf16>, vector<64x128xf32> -> vector<64x128xf32>
    %12 = arith.addf %5, %11 : vector<64x128xf32>
    %c0_13 = arith.constant 0 : index
    %c0_14 = arith.constant 0 : index
    %c1_15 = arith.constant 1 : index
    %c0_16 = arith.constant 0 : index
    %13 = vector.load %arg2[%c0_13, %c0_14, %c1_15, %c0_16] : memref<1x8x9x128xbf16, #tpu.memory_space<vmem>>, vector<1x8x8x128xbf16>
    %14 = vector.shape_cast %13 : vector<1x8x8x128xbf16> to vector<8x8x128xbf16>
    %15 = vector.shape_cast %14 : vector<8x8x128xbf16> to vector<64x128xbf16>
    %c2 = arith.constant 2 : index
    %c0_17 = arith.constant 0 : index
    %c0_18 = arith.constant 0 : index
    %16 = vector.load %arg8[%c2, %c0_17, %c0_18] : memref<9x128x128xbf16, #tpu.memory_space<vmem>>, vector<1x128x128xbf16>
    %17 = vector.shape_cast %16 : vector<1x128x128xbf16> to vector<128x128xbf16>
    %cst_19 = arith.constant dense<0.000000e+00> : vector<64x128xf32>
    %18 = tpu.matmul %15, %17, %cst_19 {dimension_numbers = #tpu.dot_dimension_numbers<[1], [0], [0], [1], [0, 0, 1, 1], [], []>} : vector<64x128xbf16>, vector<128x128xbf16>, vector<64x128xf32> -> vector<64x128xf32>
    %19 = arith.addf %12, %18 : vector<64x128xf32>
    %c0_20 = arith.constant 0 : index
    %c0_21 = arith.constant 0 : index
    %c0_22 = arith.constant 0 : index
    %c0_23 = arith.constant 0 : index
    %20 = vector.load %arg4[%c0_20, %c0_21, %c0_22, %c0_23] : memref<1x8x9x128xbf16, #tpu.memory_space<vmem>>, vector<1x8x8x128xbf16>
    %21 = vector.shape_cast %20 : vector<1x8x8x128xbf16> to vector<8x8x128xbf16>
    %22 = vector.shape_cast %21 : vector<8x8x128xbf16> to vector<64x128xbf16>
    %c3 = arith.constant 3 : index
    %c0_24 = arith.constant 0 : index
    %c0_25 = arith.constant 0 : index
    %23 = vector.load %arg8[%c3, %c0_24, %c0_25] : memref<9x128x128xbf16, #tpu.memory_space<vmem>>, vector<1x128x128xbf16>
    %24 = vector.shape_cast %23 : vector<1x128x128xbf16> to vector<128x128xbf16>
    %cst_26 = arith.constant dense<0.000000e+00> : vector<64x128xf32>
    %25 = tpu.matmul %22, %24, %cst_26 {dimension_numbers = #tpu.dot_dimension_numbers<[1], [0], [0], [1], [0, 0, 1, 1], [], []>} : vector<64x128xbf16>, vector<128x128xbf16>, vector<64x128xf32> -> vector<64x128xf32>
    %26 = arith.addf %19, %25 : vector<64x128xf32>
    %c0_27 = arith.constant 0 : index
    %c0_28 = arith.constant 0 : index
    %c0_29 = arith.constant 0 : index
    %c0_30 = arith.constant 0 : index
    %27 = vector.load %arg5[%c0_27, %c0_28, %c0_29, %c0_30] : memref<1x8x9x128xbf16, #tpu.memory_space<vmem>>, vector<1x8x8x128xbf16>
    %28 = vector.shape_cast %27 : vector<1x8x8x128xbf16> to vector<8x8x128xbf16>
    %29 = vector.shape_cast %28 : vector<8x8x128xbf16> to vector<64x128xbf16>
    %c4 = arith.constant 4 : index
    %c0_31 = arith.constant 0 : index
    %c0_32 = arith.constant 0 : index
    %30 = vector.load %arg8[%c4, %c0_31, %c0_32] : memref<9x128x128xbf16, #tpu.memory_space<vmem>>, vector<1x128x128xbf16>
    %31 = vector.shape_cast %30 : vector<1x128x128xbf16> to vector<128x128xbf16>
    %cst_33 = arith.constant dense<0.000000e+00> : vector<64x128xf32>
    %32 = tpu.matmul %29, %31, %cst_33 {dimension_numbers = #tpu.dot_dimension_numbers<[1], [0], [0], [1], [0, 0, 1, 1], [], []>} : vector<64x128xbf16>, vector<128x128xbf16>, vector<64x128xf32> -> vector<64x128xf32>
    %33 = arith.addf %26, %32 : vector<64x128xf32>
    %c0_34 = arith.constant 0 : index
    %c0_35 = arith.constant 0 : index
    %c1_36 = arith.constant 1 : index
    %c0_37 = arith.constant 0 : index
    %34 = vector.load %arg4[%c0_34, %c0_35, %c1_36, %c0_37] : memref<1x8x9x128xbf16, #tpu.memory_space<vmem>>, vector<1x8x8x128xbf16>
    %35 = vector.shape_cast %34 : vector<1x8x8x128xbf16> to vector<8x8x128xbf16>
    %36 = vector.shape_cast %35 : vector<8x8x128xbf16> to vector<64x128xbf16>
    %c5 = arith.constant 5 : index
    %c0_38 = arith.constant 0 : index
    %c0_39 = arith.constant 0 : index
    %37 = vector.load %arg8[%c5, %c0_38, %c0_39] : memref<9x128x128xbf16, #tpu.memory_space<vmem>>, vector<1x128x128xbf16>
    %38 = vector.shape_cast %37 : vector<1x128x128xbf16> to vector<128x128xbf16>
    %cst_40 = arith.constant dense<0.000000e+00> : vector<64x128xf32>
    %39 = tpu.matmul %36, %38, %cst_40 {dimension_numbers = #tpu.dot_dimension_numbers<[1], [0], [0], [1], [0, 0, 1, 1], [], []>} : vector<64x128xbf16>, vector<128x128xbf16>, vector<64x128xf32> -> vector<64x128xf32>
    %40 = arith.addf %33, %39 : vector<64x128xf32>
    %c0_41 = arith.constant 0 : index
    %c0_42 = arith.constant 0 : index
    %c0_43 = arith.constant 0 : index
    %c0_44 = arith.constant 0 : index
    %41 = vector.load %arg6[%c0_41, %c0_42, %c0_43, %c0_44] : memref<1x8x9x128xbf16, #tpu.memory_space<vmem>>, vector<1x8x8x128xbf16>
    %42 = vector.shape_cast %41 : vector<1x8x8x128xbf16> to vector<8x8x128xbf16>
    %43 = vector.shape_cast %42 : vector<8x8x128xbf16> to vector<64x128xbf16>
    %c6 = arith.constant 6 : index
    %c0_45 = arith.constant 0 : index
    %c0_46 = arith.constant 0 : index
    %44 = vector.load %arg8[%c6, %c0_45, %c0_46] : memref<9x128x128xbf16, #tpu.memory_space<vmem>>, vector<1x128x128xbf16>
    %45 = vector.shape_cast %44 : vector<1x128x128xbf16> to vector<128x128xbf16>
    %cst_47 = arith.constant dense<0.000000e+00> : vector<64x128xf32>
    %46 = tpu.matmul %43, %45, %cst_47 {dimension_numbers = #tpu.dot_dimension_numbers<[1], [0], [0], [1], [0, 0, 1, 1], [], []>} : vector<64x128xbf16>, vector<128x128xbf16>, vector<64x128xf32> -> vector<64x128xf32>
    %47 = arith.addf %40, %46 : vector<64x128xf32>
    %c0_48 = arith.constant 0 : index
    %c0_49 = arith.constant 0 : index
    %c0_50 = arith.constant 0 : index
    %c0_51 = arith.constant 0 : index
    %48 = vector.load %arg7[%c0_48, %c0_49, %c0_50, %c0_51] : memref<1x8x9x128xbf16, #tpu.memory_space<vmem>>, vector<1x8x8x128xbf16>
    %49 = vector.shape_cast %48 : vector<1x8x8x128xbf16> to vector<8x8x128xbf16>
    %50 = vector.shape_cast %49 : vector<8x8x128xbf16> to vector<64x128xbf16>
    %c7 = arith.constant 7 : index
    %c0_52 = arith.constant 0 : index
    %c0_53 = arith.constant 0 : index
    %51 = vector.load %arg8[%c7, %c0_52, %c0_53] : memref<9x128x128xbf16, #tpu.memory_space<vmem>>, vector<1x128x128xbf16>
    %52 = vector.shape_cast %51 : vector<1x128x128xbf16> to vector<128x128xbf16>
    %cst_54 = arith.constant dense<0.000000e+00> : vector<64x128xf32>
    %53 = tpu.matmul %50, %52, %cst_54 {dimension_numbers = #tpu.dot_dimension_numbers<[1], [0], [0], [1], [0, 0, 1, 1], [], []>} : vector<64x128xbf16>, vector<128x128xbf16>, vector<64x128xf32> -> vector<64x128xf32>
    %54 = arith.addf %47, %53 : vector<64x128xf32>
    %c0_55 = arith.constant 0 : index
    %c0_56 = arith.constant 0 : index
    %c1_57 = arith.constant 1 : index
    %c0_58 = arith.constant 0 : index
    %55 = vector.load %arg6[%c0_55, %c0_56, %c1_57, %c0_58] : memref<1x8x9x128xbf16, #tpu.memory_space<vmem>>, vector<1x8x8x128xbf16>
    %56 = vector.shape_cast %55 : vector<1x8x8x128xbf16> to vector<8x8x128xbf16>
    %57 = vector.shape_cast %56 : vector<8x8x128xbf16> to vector<64x128xbf16>
    %c8 = arith.constant 8 : index
    %c0_59 = arith.constant 0 : index
    %c0_60 = arith.constant 0 : index
    %58 = vector.load %arg8[%c8, %c0_59, %c0_60] : memref<9x128x128xbf16, #tpu.memory_space<vmem>>, vector<1x128x128xbf16>
    %59 = vector.shape_cast %58 : vector<1x128x128xbf16> to vector<128x128xbf16>
    %cst_61 = arith.constant dense<0.000000e+00> : vector<64x128xf32>
    %60 = tpu.matmul %57, %59, %cst_61 {dimension_numbers = #tpu.dot_dimension_numbers<[1], [0], [0], [1], [0, 0, 1, 1], [], []>} : vector<64x128xbf16>, vector<128x128xbf16>, vector<64x128xf32> -> vector<64x128xf32>
    %61 = arith.addf %54, %60 : vector<64x128xf32>
    %c0_62 = arith.constant 0 : index
    %c0_63 = arith.constant 0 : index
    %62 = vector.load %arg9[%c0_62, %c0_63] : memref<1x128xf32, #tpu.memory_space<vmem>>, vector<1x128xf32>
    %63 = vector.broadcast %62 : vector<1x128xf32> to vector<64x128xf32>
    %64 = arith.addf %61, %63 : vector<64x128xf32>
    %cst_64 = arith.constant 0.000000e+00 : f32
    %65 = vector.broadcast %cst_64 : f32 to vector<64x128xf32>
    %66 = arith.maximumf %64, %65 : vector<64x128xf32>
    %67 = arith.truncf %66 : vector<64x128xf32> to vector<64x128xbf16>
    %c0_65 = arith.constant 0 : index
    %c0_66 = arith.constant 0 : index
    %68 = vector.load %arg10[%c0_65, %c0_66] : memref<128x128xbf16, #tpu.memory_space<vmem>>, vector<128x128xbf16>
    %cst_67 = arith.constant dense<0.000000e+00> : vector<64x128xf32>
    %69 = tpu.matmul %67, %68, %cst_67 {dimension_numbers = #tpu.dot_dimension_numbers<[1], [0], [0], [1], [0, 0, 1, 1], [], []>} : vector<64x128xbf16>, vector<128x128xbf16>, vector<64x128xf32> -> vector<64x128xf32>
    %c0_68 = arith.constant 0 : index
    %c0_69 = arith.constant 0 : index
    %70 = vector.load %arg11[%c0_68, %c0_69] : memref<1x128xf32, #tpu.memory_space<vmem>>, vector<1x128xf32>
    %71 = vector.broadcast %70 : vector<1x128xf32> to vector<64x128xf32>
    %72 = arith.addf %69, %71 : vector<64x128xf32>
    %c0_70 = arith.constant 0 : index
    %c0_71 = arith.constant 0 : index
    %c0_72 = arith.constant 0 : index
    %73 = vector.load %arg12[%c0_70, %c0_71, %c0_72] : memref<1x64x128xf32, #tpu.memory_space<vmem>>, vector<1x64x128xf32>
    %74 = vector.shape_cast %73 : vector<1x64x128xf32> to vector<64x128xf32>
    %75 = vector.shape_cast %72 : vector<64x128xf32> to vector<1x64x128xf32>
    tpu.vector_store %arg12[%c0_70, %c0_71, %c0_72], %75 {strides = array<i32>} : memref<1x64x128xf32, #tpu.memory_space<vmem>>, vector<1x64x128xf32>,
    return
  }
  func.func @transform_0(%arg0: i32, %arg1: i32) -> (i32, i32, i32, i32) {
    %c0_i32 = arith.constant 0 : i32
    %c0_i32_0 = arith.constant 0 : i32
    %c0_i32_1 = arith.constant 0 : i32
    return %arg0, %arg1, %c0_i32, %c0_i32_0 : i32, i32, i32, i32
  }
  func.func @transform_1(%arg0: i32, %arg1: i32) -> (i32, i32, i32, i32) {
    %c0_i32 = arith.constant 0 : i32
    %c0_i32_0 = arith.constant 0 : i32
    %c0_i32_1 = arith.constant 0 : i32
    return %arg0, %arg1, %c0_i32, %c0_i32_0 : i32, i32, i32, i32
  }
  func.func @transform_2(%arg0: i32, %arg1: i32) -> (i32, i32, i32, i32) {
    %c0_i32 = arith.constant 0 : i32
    %c0_i32_0 = arith.constant 0 : i32
    %c0_i32_1 = arith.constant 0 : i32
    return %arg0, %arg1, %c0_i32, %c0_i32_0 : i32, i32, i32, i32
  }
  func.func @transform_3(%arg0: i32, %arg1: i32) -> (i32, i32, i32, i32) {
    %c0_i32 = arith.constant 0 : i32
    %c0_i32_0 = arith.constant 0 : i32
    %c0_i32_1 = arith.constant 0 : i32
    return %arg0, %arg1, %c0_i32, %c0_i32_0 : i32, i32, i32, i32
  }
  func.func @transform_4(%arg0: i32, %arg1: i32) -> (i32, i32, i32, i32) {
    %c0_i32 = arith.constant 0 : i32
    %c0_i32_0 = arith.constant 0 : i32
    %c0_i32_1 = arith.constant 0 : i32
    return %arg0, %arg1, %c0_i32, %c0_i32_0 : i32, i32, i32, i32
  }
  func.func @transform_5(%arg0: i32, %arg1: i32) -> (i32, i32, i32, i32) {
    %c0_i32 = arith.constant 0 : i32
    %c0_i32_0 = arith.constant 0 : i32
    %c0_i32_1 = arith.constant 0 : i32
    return %arg0, %arg1, %c0_i32, %c0_i32_0 : i32, i32, i32, i32
  }
  func.func @transform_6(%arg0: i32, %arg1: i32) -> (i32, i32, i32) {
    %c0_i32 = arith.constant 0 : i32
    %c0_i32_0 = arith.constant 0 : i32
    %c0_i32_1 = arith.constant 0 : i32
    %c0_i32_2 = arith.constant 0 : i32
    return %c0_i32, %c0_i32_0, %c0_i32_1 : i32, i32, i32
  }
  func.func @transform_7(%arg0: i32, %arg1: i32) -> (i32, i32) {
    %c0_i32 = arith.constant 0 : i32
    %c0_i32_0 = arith.constant 0 : i32
    %c0_i32_1 = arith.constant 0 : i32
    return %c0_i32, %c0_i32_0 : i32, i32
  }
  func.func @transform_8(%arg0: i32, %arg1: i32) -> (i32, i32) {
    %c0_i32 = arith.constant 0 : i32
    %c0_i32_0 = arith.constant 0 : i32
    %c0_i32_1 = arith.constant 0 : i32
    return %c0_i32, %c0_i32_0 : i32, i32
  }
  func.func @transform_9(%arg0: i32, %arg1: i32) -> (i32, i32) {
    %c0_i32 = arith.constant 0 : i32
    %c0_i32_0 = arith.constant 0 : i32
    %c0_i32_1 = arith.constant 0 : i32
    return %c0_i32, %c0_i32_0 : i32, i32
  }
  func.func @transform_10(%arg0: i32, %arg1: i32) -> (i32, i32, i32) {
    %c0_i32 = arith.constant 0 : i32
    %c0_i32_0 = arith.constant 0 : i32
    return %arg0, %arg1, %c0_i32 : i32, i32, i32
  }
}

</mosaic_0001>

<bundles_post_ra>
// kernel: bottleneck_transform_forward.2
= control target key start
LH: loop header
LB: loop body
LE: loop exit
PB: predicated region body
PF: predicated region fallthrough
CT: control target
= control target key end

     0   :  { %s1424_s1 = inlined_call_operand.vmem [shape: bf16[128,128], index: 1, kind: input, shape index: {}]   ;;  %s1425_s2 = inlined_call_operand.vmem [shape: f32[1,128], index: 2, kind: input, shape index: {}]   ;;  %s1426_s0 = inlined_call_operand.vmem [shape: bf16[512,128], index: 0, kind: input, shape index: {}]   ;;  %s1427_s3 = inlined_call_operand.vmem [shape: bf16[512,128], index: 3, kind: output, shape index: {}]  }
   0x1   :  { %v902_v0 = vld [vmem:[%s1424_s1 + $0x38] sm:$0xff]  ;;  %v901_v1 = vld [vmem:[%s1424_s1 + $0x30] sm:$0xff]  ;;  %v900_v2 = vld [vmem:[%s1424_s1 + $0x28] sm:$0xff] }
   0x2   :  { %338 = vmatpush.bf16.msra.mxu0 %v902_v0  ;;  %1094 = vmatpush.bf16.msra.mxu1 %v902_v0  ;;  %v899_v3 = vld [vmem:[%s1424_s1 + $0x20] sm:$0xff]  ;;  %v898_v4 = vld [vmem:[%s1424_s1 + $0x18] sm:$0xff]  ;;  %v897_v5 = vld [vmem:[%s1424_s1 + $0x10] sm:$0xff] }
   0x3   :  { %1095 = vmatpush.bf16.msra.mxu2 %v902_v0  ;;  %1096 = vmatpush.bf16.msra.mxu3 %v902_v0  ;;  %v896_v6 = vld [vmem:[%s1424_s1 + $0x8] sm:$0xff]  ;;  %v895_v7 = vld [vmem:[%s1424_s1] sm:$0xff]  ;;  %v865_v16 = vld [vmem:[%s1426_s0 + $0x10] sm:$0xff] }
   0x4   :  { %v863_v8 = vld [vmem:[%s1426_s0] sm:$0xff]  ;;  %v864_v12 = vld [vmem:[%s1426_s0 + $0x8] sm:$0xff]  ;;  %v873_v17 = vld [vmem:[%s1426_s0 + $0x50] sm:$0xff] }
   0x5   :  { %v871_v9 = vld [vmem:[%s1426_s0 + $0x40] sm:$0xff]  ;;  %v872_v13 = vld [vmem:[%s1426_s0 + $0x48] sm:$0xff]  ;;  %v881_v18 = vld [vmem:[%s1426_s0 + $0x90] sm:$0xff] }
   0x6   :  { %339 = vmatpush.bf16.msra.mxu0 %v901_v1  ;;  %1097 = vmatpush.bf16.msra.mxu1 %v901_v1  ;;  %v879_v10 = vld [vmem:[%s1426_s0 + $0x80] sm:$0xff]  ;;  %v880_v14 = vld [vmem:[%s1426_s0 + $0x88] sm:$0xff]  ;;  %v889_v19 = vld [vmem:[%s1426_s0 + $0xd0] sm:$0xff] }
   0x7   :  { %1098 = vmatpush.bf16.msra.mxu2 %v901_v1  ;;  %1099 = vmatpush.bf16.msra.mxu3 %v901_v1  ;;  %v887_v11 = vld [vmem:[%s1426_s0 + $0xc0] sm:$0xff]  ;;  %v888_v15 = vld [vmem:[%s1426_s0 + $0xc8] sm:$0xff]  ;;  %v866_v20 = vld [vmem:[%s1426_s0 + $0x18] sm:$0xff] }
   0x8   :  { %v874_v21 = vld [vmem:[%s1426_s0 + $0x58] sm:$0xff]  ;;  %v867_v24 = vld [vmem:[%s1426_s0 + $0x20] sm:$0xff]  ;;  %v868_v28 = vld [vmem:[%s1426_s0 + $0x28] sm:$0xff] }
   0x9   :  { %v882_v22 = vld [vmem:[%s1426_s0 + $0x98] sm:$0xff]  ;;  %v875_v25 = vld [vmem:[%s1426_s0 + $0x60] sm:$0xff]  ;;  %v876_v29 = vld [vmem:[%s1426_s0 + $0x68] sm:$0xff] }
   0xa   :  { %340 = vmatpush.bf16.msra.mxu0 %v900_v2  ;;  %1100 = vmatpush.bf16.msra.mxu1 %v900_v2  ;;  %v890_v23 = vld [vmem:[%s1426_s0 + $0xd8] sm:$0xff]  ;;  %v883_v26 = vld [vmem:[%s1426_s0 + $0xa0] sm:$0xff]  ;;  %v884_v30 = vld [vmem:[%s1426_s0 + $0xa8] sm:$0xff] }
   0xb   :  { %1101 = vmatpush.bf16.msra.mxu2 %v900_v2  ;;  %1102 = vmatpush.bf16.msra.mxu3 %v900_v2  ;;  %v891_v27 = vld [vmem:[%s1426_s0 + $0xe0] sm:$0xff]  ;;  %v892_v31 = vld [vmem:[%s1426_s0 + $0xe8] sm:$0xff]  ;;  %v869_v32 = vld [vmem:[%s1426_s0 + $0x30] sm:$0xff] }
   0xc   :  { %v877_v33 = vld [vmem:[%s1426_s0 + $0x70] sm:$0xff]  ;;  %v870_v36 = vld [vmem:[%s1426_s0 + $0x38] sm:$0xff]  ;;  %v1262_v42 = vld [vmem:[%s1425_s2] ss:$0 sm:$0xff] }
   0xd   :  { %v885_v34 = vld [vmem:[%s1426_s0 + $0xb0] sm:$0xff]  ;;  %v878_v37 = vld [vmem:[%s1426_s0 + $0x78] sm:$0xff] }
   0xe   :  { %341 = vmatpush.bf16.msra.mxu0 %v899_v3  ;;  %1103 = vmatpush.bf16.msra.mxu1 %v899_v3  ;;  %v893_v35 = vld [vmem:[%s1426_s0 + $0xf0] sm:$0xff]  ;;  %v886_v38 = vld [vmem:[%s1426_s0 + $0xb8] sm:$0xff] }
   0xf   :  { %1104 = vmatpush.bf16.msra.mxu2 %v899_v3  ;;  %1105 = vmatpush.bf16.msra.mxu3 %v899_v3  ;;  %v894_v39 = vld [vmem:[%s1426_s0 + $0xf8] sm:$0xff] }
  0x12   :  { %342 = vmatpush.bf16.msra.mxu0 %v898_v4  ;;  %1106 = vmatpush.bf16.msra.mxu1 %v898_v4 }
  0x13   :  { %1107 = vmatpush.bf16.msra.mxu2 %v898_v4  ;;  %1108 = vmatpush.bf16.msra.mxu3 %v898_v4 }
  0x16   :  { %343 = vmatpush.bf16.msra.mxu0 %v897_v5  ;;  %1109 = vmatpush.bf16.msra.mxu1 %v897_v5 }
  0x17   :  { %1110 = vmatpush.bf16.msra.mxu2 %v897_v5  ;;  %1111 = vmatpush.bf16.msra.mxu3 %v897_v5 }
  0x1a   :  { %344 = vmatpush.bf16.msra.mxu0 %v896_v6  ;;  %1112 = vmatpush.bf16.msra.mxu1 %v896_v6 }
  0x1b   :  { %1113 = vmatpush.bf16.msra.mxu2 %v896_v6  ;;  %1114 = vmatpush.bf16.msra.mxu3 %v896_v6 }
  0x1e   :  { %345 = vmatpush.bf16.msra.mxu0 %v895_v7  ;;  %1115 = vmatpush.bf16.msra.mxu1 %v895_v7 }
  0x1f   :  { %1116 = vmatpush.bf16.msra.mxu2 %v895_v7  ;;  %1117 = vmatpush.bf16.msra.mxu3 %v895_v7 }
  0x21   :  { %346 = vmatmul.bf16.vlgmr.msra.gmra.mxu0 %v863_v8  ;;  %386 = vmatmul.bf16.vlgmr.msra.gmra.mxu1 %v871_v9 }
  0x22   :  { %426 = vmatmul.bf16.vlgmr.msra.gmra.mxu2 %v879_v10  ;;  %466 = vmatmul.bf16.vlgmr.msra.gmra.mxu3 %v887_v11 }
  0x31   :  { %351 = vmatmul.bf16.gmra.mxu0 %v864_v12  ;;  %391 = vmatmul.bf16.gmra.mxu1 %v872_v13 }
  0x32   :  { %431 = vmatmul.bf16.gmra.mxu2 %v880_v14  ;;  %471 = vmatmul.bf16.gmra.mxu3 %v888_v15 }
  0x41   :  { %356 = vmatmul.bf16.gmra.mxu0 %v865_v16  ;;  %396 = vmatmul.bf16.gmra.mxu1 %v873_v17 }
  0x42   :  { %436 = vmatmul.bf16.gmra.mxu2 %v881_v18  ;;  %476 = vmatmul.bf16.gmra.mxu3 %v889_v19 }
  0x51   :  { %361 = vmatmul.bf16.gmra.mxu0 %v866_v20  ;;  %401 = vmatmul.bf16.gmra.mxu1 %v874_v21 }
  0x52   :  { %441 = vmatmul.bf16.gmra.mxu2 %v882_v22  ;;  %481 = vmatmul.bf16.gmra.mxu3 %v890_v23 }
  0x61   :  { %366 = vmatmul.bf16.gmra.mxu0 %v867_v24  ;;  %406 = vmatmul.bf16.gmra.mxu1 %v875_v25 }
  0x62   :  { %446 = vmatmul.bf16.gmra.mxu2 %v883_v26  ;;  %486 = vmatmul.bf16.gmra.mxu3 %v891_v27 }
  0x71   :  { %371 = vmatmul.bf16.gmra.mxu0 %v868_v28  ;;  %411 = vmatmul.bf16.gmra.mxu1 %v876_v29 }
  0x72   :  { %451 = vmatmul.bf16.gmra.mxu2 %v884_v30  ;;  %491 = vmatmul.bf16.gmra.mxu3 %v892_v31 }
  0x81   :  { %376 = vmatmul.bf16.gmra.mxu0 %v869_v32  ;;  %416 = vmatmul.bf16.gmra.mxu1 %v877_v33 }
  0x82   :  { %456 = vmatmul.bf16.gmra.mxu2 %v885_v34  ;;  %496 = vmatmul.bf16.gmra.mxu3 %v893_v35 }
  0x91   :  { %381 = vmatmul.bf16.gmra.mxu0 %v870_v36  ;;  %421 = vmatmul.bf16.gmra.mxu1 %v878_v37 }
  0x92   :  { %461 = vmatmul.bf16.gmra.mxu2 %v886_v38  ;;  %501 = vmatmul.bf16.gmra.mxu3 %v894_v39 }
  0x9e   :  { %v347_v40 = vpop.f32.mrf.mxu0  ;;  %v387_v41 = vpop.f32.mrf.mxu1 }
  0x9f   :  { %v348_v43 = vadd.f32 %v1262_v42, %v347_v40  ;;  %v388_v44 = vadd.f32 %v1262_v42, %v387_v41 }
  0xa1   :  { %v507_v51 = vmax.f32 %v348_v43, 0.0  ;;  %v523_v52 = vmax.f32 %v388_v44, 0.0 }
  0xa5   :  { %v427_v45 = vpop.f32.mrf.mxu2  ;;  %v467_v46 = vpop.f32.mrf.mxu3 }
  0xa6   :  { %v349_v47 = vpop.f32.mrf.mxu0  ;;  %v389_v48 = vpop.f32.mrf.mxu1  ;;  %v428_v57 = vadd.f32 %v1262_v42, %v427_v45  ;;  %v468_v58 = vadd.f32 %v1262_v42, %v467_v46 }
  0xa7   :  { %v350_v49 = vadd.f32 %v1262_v42, %v349_v47  ;;  %v390_v50 = vadd.f32 %v1262_v42, %v389_v48 }
  0xa8   :  { %v539_v1 = vmax.f32 %v428_v57, 0.0  ;;  %v555_v2 = vmax.f32 %v468_v58, 0.0 }
  0xa9   :  { %v508_v53 = vmax.f32 %v350_v49, 0.0  ;;  %v524_v54 = vmax.f32 %v390_v50, 0.0 }
  0xab   :  { %v906_v55 = vpack.c.bf16 %v508_v53, %v507_v51  ;;  %v946_v56 = vpack.c.bf16 %v524_v54, %v523_v52 }
  0xad   :  { %907 = vst [vmem:[%s1427_s3] sm:$0xff] %v906_v55   ;;  %v429_v59 = vpop.f32.mrf.mxu2  ;;  %v469_v60 = vpop.f32.mrf.mxu3 }
  0xae   :  { %1070 = vst [vmem:[%s1427_s3 + $0x40] sm:$0xff] %v946_v56   ;;  %v430_v61 = vadd.f32 %v1262_v42, %v429_v59  ;;  %v470_v62 = vadd.f32 %v1262_v42, %v469_v60  ;;  %v352_v63 = vpop.f32.mrf.mxu0  ;;  %v392_v0 = vpop.f32.mrf.mxu1 }
  0xaf   :  { %v353_v7 = vadd.f32 %v1262_v42, %v352_v63  ;;  %v393_v8 = vadd.f32 %v1262_v42, %v392_v0 }
  0xb0   :  { %v540_v3 = vmax.f32 %v430_v61, 0.0  ;;  %v556_v4 = vmax.f32 %v470_v62, 0.0 }
  0xb1   :  { %v509_v15 = vmax.f32 %v353_v7, 0.0  ;;  %v525_v16 = vmax.f32 %v393_v8, 0.0 }
  0xb2   :  { %v986_v5 = vpack.c.bf16 %v540_v3, %v539_v1  ;;  %v1026_v6 = vpack.c.bf16 %v556_v4, %v555_v2 }
  0xb4   :  { %1078 = vst [vmem:[%s1427_s3 + $0x80] sm:$0xff] %v986_v5  }
  0xb5   :  { %1086 = vst [vmem:[%s1427_s3 + $0xc0] sm:$0xff] %v1026_v6   ;;  %v432_v9 = vpop.f32.mrf.mxu2  ;;  %v472_v10 = vpop.f32.mrf.mxu3 }
  0xb6   :  { %v354_v11 = vpop.f32.mrf.mxu0  ;;  %v394_v12 = vpop.f32.mrf.mxu1  ;;  %v433_v21 = vadd.f32 %v1262_v42, %v432_v9  ;;  %v473_v22 = vadd.f32 %v1262_v42, %v472_v10 }
  0xb7   :  { %v355_v13 = vadd.f32 %v1262_v42, %v354_v11  ;;  %v395_v14 = vadd.f32 %v1262_v42, %v394_v12 }
  0xb8   :  { %v541_v29 = vmax.f32 %v433_v21, 0.0  ;;  %v557_v30 = vmax.f32 %v473_v22, 0.0 }
  0xb9   :  { %v510_v17 = vmax.f32 %v355_v13, 0.0  ;;  %v526_v18 = vmax.f32 %v395_v14, 0.0 }
  0xbb   :  { %v911_v19 = vpack.c.bf16 %v510_v17, %v509_v15  ;;  %v951_v20 = vpack.c.bf16 %v526_v18, %v525_v16 }
  0xbd   :  { %1063 = vst [vmem:[%s1427_s3 + $0x8] sm:$0xff] %v911_v19   ;;  %v434_v23 = vpop.f32.mrf.mxu2  ;;  %v474_v24 = vpop.f32.mrf.mxu3 }
  0xbe   :  { %1071 = vst [vmem:[%s1427_s3 + $0x48] sm:$0xff] %v951_v20   ;;  %v435_v25 = vadd.f32 %v1262_v42, %v434_v23  ;;  %v475_v26 = vadd.f32 %v1262_v42, %v474_v24  ;;  %v357_v27 = vpop.f32.mrf.mxu0  ;;  %v397_v28 = vpop.f32.mrf.mxu1 }
  0xbf   :  { %v358_v35 = vadd.f32 %v1262_v42, %v357_v27  ;;  %v398_v36 = vadd.f32 %v1262_v42, %v397_v28 }
  0xc0   :  { %v542_v31 = vmax.f32 %v435_v25, 0.0  ;;  %v558_v32 = vmax.f32 %v475_v26, 0.0 }
  0xc1   :  { %v511_v44 = vmax.f32 %v358_v35, 0.0  ;;  %v527_v45 = vmax.f32 %v398_v36, 0.0 }
  0xc2   :  { %v991_v33 = vpack.c.bf16 %v542_v31, %v541_v29  ;;  %v1031_v34 = vpack.c.bf16 %v558_v32, %v557_v30 }
  0xc4   :  { %1079 = vst [vmem:[%s1427_s3 + $0x88] sm:$0xff] %v991_v33  }
  0xc5   :  { %1087 = vst [vmem:[%s1427_s3 + $0xc8] sm:$0xff] %v1031_v34   ;;  %v437_v37 = vpop.f32.mrf.mxu2  ;;  %v477_v38 = vpop.f32.mrf.mxu3 }
  0xc6   :  { %v359_v39 = vpop.f32.mrf.mxu0  ;;  %v399_v40 = vpop.f32.mrf.mxu1  ;;  %v438_v50 = vadd.f32 %v1262_v42, %v437_v37  ;;  %v478_v51 = vadd.f32 %v1262_v42, %v477_v38 }
  0xc7   :  { %v360_v41 = vadd.f32 %v1262_v42, %v359_v39  ;;  %v400_v43 = vadd.f32 %v1262_v42, %v399_v40 }
  0xc8   :  { %v543_v58 = vmax.f32 %v438_v50, 0.0  ;;  %v559_v59 = vmax.f32 %v478_v51, 0.0 }
  0xc9   :  { %v512_v46 = vmax.f32 %v360_v41, 0.0  ;;  %v528_v47 = vmax.f32 %v400_v43, 0.0 }
  0xcb   :  { %v916_v48 = vpack.c.bf16 %v512_v46, %v511_v44  ;;  %v956_v49 = vpack.c.bf16 %v528_v47, %v527_v45 }
  0xcd   :  { %1064 = vst [vmem:[%s1427_s3 + $0x10] sm:$0xff] %v916_v48   ;;  %v439_v52 = vpop.f32.mrf.mxu2  ;;  %v479_v53 = vpop.f32.mrf.mxu3 }
  0xce   :  { %1072 = vst [vmem:[%s1427_s3 + $0x50] sm:$0xff] %v956_v49   ;;  %v440_v54 = vadd.f32 %v1262_v42, %v439_v52  ;;  %v480_v55 = vadd.f32 %v1262_v42, %v479_v53  ;;  %v362_v56 = vpop.f32.mrf.mxu0  ;;  %v402_v57 = vpop.f32.mrf.mxu1 }
  0xcf   :  { %v363_v0 = vadd.f32 %v1262_v42, %v362_v56  ;;  %v403_v1 = vadd.f32 %v1262_v42, %v402_v57 }
  0xd0   :  { %v544_v60 = vmax.f32 %v440_v54, 0.0  ;;  %v560_v61 = vmax.f32 %v480_v55, 0.0 }
  0xd1   :  { %v513_v8 = vmax.f32 %v363_v0, 0.0  ;;  %v529_v9 = vmax.f32 %v403_v1, 0.0 }
  0xd2   :  { %v996_v62 = vpack.c.bf16 %v544_v60, %v543_v58  ;;  %v1036_v63 = vpack.c.bf16 %v560_v61, %v559_v59 }
  0xd4   :  { %1080 = vst [vmem:[%s1427_s3 + $0x90] sm:$0xff] %v996_v62  }
  0xd5   :  { %1088 = vst [vmem:[%s1427_s3 + $0xd0] sm:$0xff] %v1036_v63   ;;  %v442_v2 = vpop.f32.mrf.mxu2  ;;  %v482_v3 = vpop.f32.mrf.mxu3 }
  0xd6   :  { %v364_v4 = vpop.f32.mrf.mxu0  ;;  %v404_v5 = vpop.f32.mrf.mxu1  ;;  %v443_v14 = vadd.f32 %v1262_v42, %v442_v2  ;;  %v483_v15 = vadd.f32 %v1262_v42, %v482_v3 }
  0xd7   :  { %v365_v6 = vadd.f32 %v1262_v42, %v364_v4  ;;  %v405_v7 = vadd.f32 %v1262_v42, %v404_v5 }
  0xd8   :  { %v545_v22 = vmax.f32 %v443_v14, 0.0  ;;  %v561_v23 = vmax.f32 %v483_v15, 0.0 }
  0xd9   :  { %v514_v10 = vmax.f32 %v365_v6, 0.0  ;;  %v530_v11 = vmax.f32 %v405_v7, 0.0 }
  0xdb   :  { %v921_v12 = vpack.c.bf16 %v514_v10, %v513_v8  ;;  %v961_v13 = vpack.c.bf16 %v530_v11, %v529_v9 }
  0xdd   :  { %1065 = vst [vmem:[%s1427_s3 + $0x18] sm:$0xff] %v921_v12   ;;  %v444_v16 = vpop.f32.mrf.mxu2  ;;  %v484_v17 = vpop.f32.mrf.mxu3 }
  0xde   :  { %1073 = vst [vmem:[%s1427_s3 + $0x58] sm:$0xff] %v961_v13   ;;  %v445_v18 = vadd.f32 %v1262_v42, %v444_v16  ;;  %v485_v19 = vadd.f32 %v1262_v42, %v484_v17  ;;  %v367_v20 = vpop.f32.mrf.mxu0  ;;  %v407_v21 = vpop.f32.mrf.mxu1 }
  0xdf   :  { %v368_v28 = vadd.f32 %v1262_v42, %v367_v20  ;;  %v408_v29 = vadd.f32 %v1262_v42, %v407_v21 }
  0xe0   :  { %v546_v24 = vmax.f32 %v445_v18, 0.0  ;;  %v562_v25 = vmax.f32 %v485_v19, 0.0 }
  0xe1   :  { %v515_v36 = vmax.f32 %v368_v28, 0.0  ;;  %v531_v37 = vmax.f32 %v408_v29, 0.0 }
  0xe2   :  { %v1001_v26 = vpack.c.bf16 %v546_v24, %v545_v22  ;;  %v1041_v27 = vpack.c.bf16 %v562_v25, %v561_v23 }
  0xe4   :  { %1081 = vst [vmem:[%s1427_s3 + $0x98] sm:$0xff] %v1001_v26  }
  0xe5   :  { %1089 = vst [vmem:[%s1427_s3 + $0xd8] sm:$0xff] %v1041_v27   ;;  %v447_v30 = vpop.f32.mrf.mxu2  ;;  %v487_v31 = vpop.f32.mrf.mxu3 }
  0xe6   :  { %v369_v32 = vpop.f32.mrf.mxu0  ;;  %v409_v33 = vpop.f32.mrf.mxu1  ;;  %v448_v43 = vadd.f32 %v1262_v42, %v447_v30  ;;  %v488_v44 = vadd.f32 %v1262_v42, %v487_v31 }
  0xe7   :  { %v370_v34 = vadd.f32 %v1262_v42, %v369_v32  ;;  %v410_v35 = vadd.f32 %v1262_v42, %v409_v33 }
  0xe8   :  { %v547_v51 = vmax.f32 %v448_v43, 0.0  ;;  %v563_v52 = vmax.f32 %v488_v44, 0.0 }
  0xe9   :  { %v516_v38 = vmax.f32 %v370_v34, 0.0  ;;  %v532_v39 = vmax.f32 %v410_v35, 0.0 }
  0xeb   :  { %v926_v40 = vpack.c.bf16 %v516_v38, %v515_v36  ;;  %v966_v41 = vpack.c.bf16 %v532_v39, %v531_v37 }
  0xed   :  { %1066 = vst [vmem:[%s1427_s3 + $0x20] sm:$0xff] %v926_v40   ;;  %v449_v45 = vpop.f32.mrf.mxu2  ;;  %v489_v46 = vpop.f32.mrf.mxu3 }
  0xee   :  { %1074 = vst [vmem:[%s1427_s3 + $0x60] sm:$0xff] %v966_v41   ;;  %v450_v47 = vadd.f32 %v1262_v42, %v449_v45  ;;  %v490_v48 = vadd.f32 %v1262_v42, %v489_v46  ;;  %v372_v49 = vpop.f32.mrf.mxu0  ;;  %v412_v50 = vpop.f32.mrf.mxu1 }
  0xef   :  { %v373_v57 = vadd.f32 %v1262_v42, %v372_v49  ;;  %v413_v58 = vadd.f32 %v1262_v42, %v412_v50 }
  0xf0   :  { %v548_v53 = vmax.f32 %v450_v47, 0.0  ;;  %v564_v54 = vmax.f32 %v490_v48, 0.0 }
  0xf1   :  { %v517_v1 = vmax.f32 %v373_v57, 0.0  ;;  %v533_v2 = vmax.f32 %v413_v58, 0.0 }
  0xf2   :  { %v1006_v55 = vpack.c.bf16 %v548_v53, %v547_v51  ;;  %v1046_v56 = vpack.c.bf16 %v564_v54, %v563_v52 }
  0xf4   :  { %1082 = vst [vmem:[%s1427_s3 + $0xa0] sm:$0xff] %v1006_v55  }
  0xf5   :  { %1090 = vst [vmem:[%s1427_s3 + $0xe0] sm:$0xff] %v1046_v56   ;;  %v452_v59 = vpop.f32.mrf.mxu2  ;;  %v492_v60 = vpop.f32.mrf.mxu3 }
  0xf6   :  { %v374_v61 = vpop.f32.mrf.mxu0  ;;  %v414_v62 = vpop.f32.mrf.mxu1  ;;  %v453_v7 = vadd.f32 %v1262_v42, %v452_v59  ;;  %v493_v8 = vadd.f32 %v1262_v42, %v492_v60 }
  0xf7   :  { %v375_v63 = vadd.f32 %v1262_v42, %v374_v61  ;;  %v415_v0 = vadd.f32 %v1262_v42, %v414_v62 }
  0xf8   :  { %v549_v15 = vmax.f32 %v453_v7, 0.0  ;;  %v565_v16 = vmax.f32 %v493_v8, 0.0 }
  0xf9   :  { %v518_v3 = vmax.f32 %v375_v63, 0.0  ;;  %v534_v4 = vmax.f32 %v415_v0, 0.0 }
  0xfb   :  { %v931_v5 = vpack.c.bf16 %v518_v3, %v517_v1  ;;  %v971_v6 = vpack.c.bf16 %v534_v4, %v533_v2 }
  0xfd   :  { %1067 = vst [vmem:[%s1427_s3 + $0x28] sm:$0xff] %v931_v5   ;;  %v454_v9 = vpop.f32.mrf.mxu2  ;;  %v494_v10 = vpop.f32.mrf.mxu3 }
  0xfe   :  { %1075 = vst [vmem:[%s1427_s3 + $0x68] sm:$0xff] %v971_v6   ;;  %v455_v11 = vadd.f32 %v1262_v42, %v454_v9  ;;  %v495_v12 = vadd.f32 %v1262_v42, %v494_v10  ;;  %v377_v13 = vpop.f32.mrf.mxu0  ;;  %v417_v14 = vpop.f32.mrf.mxu1 }
  0xff   :  { %v378_v21 = vadd.f32 %v1262_v42, %v377_v13  ;;  %v418_v22 = vadd.f32 %v1262_v42, %v417_v14 }
 0x100   :  { %v550_v17 = vmax.f32 %v455_v11, 0.0  ;;  %v566_v18 = vmax.f32 %v495_v12, 0.0 }
 0x101   :  { %v519_v29 = vmax.f32 %v378_v21, 0.0  ;;  %v535_v30 = vmax.f32 %v418_v22, 0.0 }
 0x102   :  { %v1011_v19 = vpack.c.bf16 %v550_v17, %v549_v15  ;;  %v1051_v20 = vpack.c.bf16 %v566_v18, %v565_v16 }
 0x104   :  { %1083 = vst [vmem:[%s1427_s3 + $0xa8] sm:$0xff] %v1011_v19  }
 0x105   :  { %1091 = vst [vmem:[%s1427_s3 + $0xe8] sm:$0xff] %v1051_v20   ;;  %v457_v23 = vpop.f32.mrf.mxu2  ;;  %v497_v24 = vpop.f32.mrf.mxu3 }
 0x106   :  { %v379_v25 = vpop.f32.mrf.mxu0  ;;  %v419_v26 = vpop.f32.mrf.mxu1  ;;  %v458_v35 = vadd.f32 %v1262_v42, %v457_v23  ;;  %v498_v36 = vadd.f32 %v1262_v42, %v497_v24 }
 0x107   :  { %v380_v27 = vadd.f32 %v1262_v42, %v379_v25  ;;  %v420_v28 = vadd.f32 %v1262_v42, %v419_v26 }
 0x108   :  { %v551_v44 = vmax.f32 %v458_v35, 0.0  ;;  %v567_v45 = vmax.f32 %v498_v36, 0.0 }
 0x109   :  { %v520_v31 = vmax.f32 %v380_v27, 0.0  ;;  %v536_v32 = vmax.f32 %v420_v28, 0.0 }
 0x10b   :  { %v936_v33 = vpack.c.bf16 %v520_v31, %v519_v29  ;;  %v976_v34 = vpack.c.bf16 %v536_v32, %v535_v30 }
 0x10d   :  { %1068 = vst [vmem:[%s1427_s3 + $0x30] sm:$0xff] %v936_v33   ;;  %v459_v37 = vpop.f32.mrf.mxu2  ;;  %v499_v38 = vpop.f32.mrf.mxu3 }
 0x10e   :  { %1076 = vst [vmem:[%s1427_s3 + $0x70] sm:$0xff] %v976_v34   ;;  %v460_v39 = vadd.f32 %v1262_v42, %v459_v37  ;;  %v500_v40 = vadd.f32 %v1262_v42, %v499_v38  ;;  %v382_v41 = vpop.f32.mrf.mxu0  ;;  %v422_v43 = vpop.f32.mrf.mxu1 }
 0x10f   :  { %v383_v50 = vadd.f32 %v1262_v42, %v382_v41  ;;  %v423_v51 = vadd.f32 %v1262_v42, %v422_v43 }
 0x110   :  { %v552_v46 = vmax.f32 %v460_v39, 0.0  ;;  %v568_v47 = vmax.f32 %v500_v40, 0.0 }
 0x111   :  { %v521_v58 = vmax.f32 %v383_v50, 0.0  ;;  %v537_v59 = vmax.f32 %v423_v51, 0.0 }
 0x112   :  { %v1016_v48 = vpack.c.bf16 %v552_v46, %v551_v44  ;;  %v1056_v49 = vpack.c.bf16 %v568_v47, %v567_v45 }
 0x114   :  { %1084 = vst [vmem:[%s1427_s3 + $0xb0] sm:$0xff] %v1016_v48  }
 0x115   :  { %1092 = vst [vmem:[%s1427_s3 + $0xf0] sm:$0xff] %v1056_v49   ;;  %v462_v52 = vpop.f32.mrf.mxu2  ;;  %v502_v53 = vpop.f32.mrf.mxu3 }
 0x116   :  { %v384_v54 = vpop.f32.mrf.mxu0  ;;  %v424_v55 = vpop.f32.mrf.mxu1  ;;  %v463_v0 = vadd.f32 %v1262_v42, %v462_v52  ;;  %v503_v1 = vadd.f32 %v1262_v42, %v502_v53 }
 0x117   :  { %v385_v56 = vadd.f32 %v1262_v42, %v384_v54  ;;  %v425_v57 = vadd.f32 %v1262_v42, %v424_v55 }
 0x118   :  { %v553_v6 = vmax.f32 %v463_v0, 0.0  ;;  %v569_v7 = vmax.f32 %v503_v1, 0.0 }
 0x119   :  { %v522_v60 = vmax.f32 %v385_v56, 0.0  ;;  %v538_v61 = vmax.f32 %v425_v57, 0.0 }
 0x11b   :  { %v941_v62 = vpack.c.bf16 %v522_v60, %v521_v58  ;;  %v981_v63 = vpack.c.bf16 %v538_v61, %v537_v59 }
 0x11d   :  { %1069 = vst [vmem:[%s1427_s3 + $0x38] sm:$0xff] %v941_v62   ;;  %v464_v2 = vpop.f32.mrf.mxu2  ;;  %v504_v3 = vpop.f32.mrf.mxu3 }
 0x11e   :  { %1077 = vst [vmem:[%s1427_s3 + $0x78] sm:$0xff] %v981_v63   ;;  %v465_v4 = vadd.f32 %v1262_v42, %v464_v2  ;;  %v505_v5 = vadd.f32 %v1262_v42, %v504_v3 }
 0x120   :  { %v554_v8 = vmax.f32 %v465_v4, 0.0  ;;  %v570_v9 = vmax.f32 %v505_v5, 0.0 }
 0x122   :  { %v1021_v10 = vpack.c.bf16 %v554_v8, %v553_v6  ;;  %v1061_v11 = vpack.c.bf16 %v570_v9, %v569_v7 }
 0x124   :  { %1085 = vst [vmem:[%s1427_s3 + $0xb8] sm:$0xff] %v1021_v10  }
 0x125   :  { %1093 = vst [vmem:[%s1427_s3 + $0xf8] sm:$0xff] %v1061_v11  }

// kernel: bottleneck_transform_forward.3
= control target key start
LH: loop header
LB: loop body
LE: loop exit
PB: predicated region body
PF: predicated region fallthrough
CT: control target
= control target key end

     0   :  { %s3246_s13 = smov 0   ;;  %s3248_s14 = smov 0   ;;  %s3764_s0 = inlined_call_operand.vmem [shape: bf16[2,8,9,128], index: 0, kind: input, shape index: {}]   ;;  %s3765_s1 = inlined_call_operand.vmem [shape: bf16[2,8,9,128], index: 1, kind: input, shape index: {}]   ;;  %s3766_s2 = inlined_call_operand.vmem [shape: bf16[2,8,9,128], index: 2, kind: input, shape index: {}]   ;;  %s3767_s3 = inlined_call_operand.vmem [shape: bf16[2,8,9,128], index: 3, kind: input, shape index: {}]   ;;  %s3768_s4 = inlined_call_operand.vmem [shape: bf16[2,8,9,128], index: 4, kind: input, shape index: {}]   ;;  %s3769_s5 = inlined_call_operand.vmem [shape: bf16[2,8,9,128], index: 5, kind: input, shape index: {}]   ;;  %s3770_s6 = inlined_call_operand.vmem [shape: bf16[9,128,128], index: 6, kind: input, shape index: {}]   ;;  %s3771_s7 = inlined_call_operand.vmem [shape: f32[1,128], index: 7, kind: input, shape index: {}]   ;;  %s3772_s8 = inlined_call_operand.vmem [shape: bf16[128,128], index: 8, kind: input, shape index: {}]   ;;  %s3773_s9 = inlined_call_operand.vmem [shape: f32[1,128], index: 9, kind: input, shape index: {}]   ;;  %s3774_s10 = inlined_call_operand.vmem [shape: f32[2,64,128], index: 10, kind: output, shape index: {}]  }
   0x1   :  { %s3250_s15 = smov 0  }
   0x2 LB: > { %s32_s16 = sadd.s32 1, %s3185_s14  ;;  %p2453_p0 = scmp.ge.s32.totalorder %s3189_s15, 1  ;;  %s3189_s15 = sphi %s3250_s15, %s20_s15   ;;  %s3185_s14 = sphi %s3248_s14, %s3778_s14   ;;  %s3181_s13 = sphi %s3246_s13, %s3777_s13  }
   0x3   : > { %p34_p1 = scmp.ge.s32.totalorder %s32_s16, 2  ;;  %p424_p2 = scmp.lt.s32.totalorder %s3189_s15, 3 }
   0x5   : > { %s3780_s16 = smov (%p34_p1, %s32_s16), 0  ;;  %p425_p3 = pnand %p2453_p0, %p424_p2 }
   0x6   : > { %p522_p4 = scmp.lt.s32.totalorder (!%p425_p3), %s3181_s13, 1 }
   0x7   : > { %428 = sbr.rel (%p425_p3) target bundleno = 477 (0x1dd), region = 60 }
   0xc   : > { %v3044_v0 = vld [vmem:[%s3770_s6 + $0x78] sm:$0xff]  ;;  %v3043_v2 = vld [vmem:[%s3770_s6 + $0x70] sm:$0xff]  ;;  %v3042_v4 = vld [vmem:[%s3770_s6 + $0x68] sm:$0xff]  ;;  %s3782_s13 = smov (!%p522_p4, %s3181_s13), 1  ;;  %vm864_vm0 = vsmask.f32 3328 }
   0xd   : > { %v3032_v1 = vld [vmem:[%s3770_s6 + $0x38] sm:$0xff]  ;;  %3125 = vmatpush.bf16.msra.mxu2 %v3044_v0  ;;  %v3031_v3 = vld [vmem:[%s3770_s6 + $0x30] sm:$0xff]  ;;  %718 = vmatpush.bf16.msra.mxu0 %v3044_v0  ;;  %v3030_v5 = vld [vmem:[%s3770_s6 + $0x28] sm:$0xff]  ;;  %s3304_s25 = sshll.u32 %s3782_s13, 6  ;;  %vm865_vm1 = vsmask.f32 7440 }
   0xe   : > { %3133 = vmatpush.bf16.msra.mxu3 %v3032_v1  ;;  %819 = vmatpush.bf16.msra.mxu1 %v3032_v1  ;;  %v3041_v6 = vld [vmem:[%s3770_s6 + $0x60] sm:$0xff]  ;;  %v3040_v8 = vld [vmem:[%s3770_s6 + $0x58] sm:$0xff]  ;;  %v3039_v10 = vld [vmem:[%s3770_s6 + $0x50] sm:$0xff]  ;;  %s3316_s12 = scalar_lea.vmem %s3765_s1, %s3304_s25  ;;  %s3322_s18 = scalar_lea.vmem %s3764_s0, %s3304_s25 }
   0xf   : > { %v3029_v7 = vld [vmem:[%s3770_s6 + $0x20] sm:$0xff]  ;;  %v3028_v9 = vld [vmem:[%s3770_s6 + $0x18] sm:$0xff]  ;;  %v3027_v11 = vld [vmem:[%s3770_s6 + $0x10] sm:$0xff]  ;;  %s3354_s19 = scalar_lea.vmem %s3766_s2, %s3304_s25  ;;  %s3474_s17 = scalar_lea.vmem %s3767_s3, %s3304_s25 }
  0x10   : > { %v3038_v12 = vld [vmem:[%s3770_s6 + $0x48] sm:$0xff]  ;;  %v3037_v14 = vld [vmem:[%s3770_s6 + $0x40] sm:$0xff]  ;;  %v3052_v24 = vld [vmem:[%s3770_s6 + $0xb8] sm:$0xff]  ;;  %s3604_s21 = scalar_lea.vmem %s3768_s4, %s3304_s25  ;;  %s3628_s22 = scalar_lea.vmem %s3769_s5, %s3304_s25 }
  0x11   : > { %3126 = vmatpush.bf16.msra.mxu2 %v3043_v2  ;;  %719 = vmatpush.bf16.msra.mxu0 %v3043_v2  ;;  %v3026_v13 = vld [vmem:[%s3770_s6 + $0x8] sm:$0xff]  ;;  %v3025_v15 = vld [vmem:[%s3770_s6] sm:$0xff]  ;;  %v3064_v25 = vld [vmem:[%s3770_s6 + $0xf8] sm:$0xff]  ;;  %s595_s30 = scalar_lea.vmem %s3774_s10, %s3304_s25 }
  0x12   : > { %3134 = vmatpush.bf16.msra.mxu3 %v3031_v3  ;;  %820 = vmatpush.bf16.msra.mxu1 %v3031_v3  ;;  %v2494_v16 = vld [vmem:[%s3316_s12 + $0x20] sm:$0xf]  ;;  %v3035_v17 = vld [vmem:[%s3316_s12 + $0x24] sm:$0xf0]  ;;  %v3076_v30 = vld [vmem:[%s3770_s6 + $0x138] sm:$0xff] }
  0x13   : > { %v2542_v18 = vld [vmem:[%s3322_s18 + $0x20] sm:$0xf]  ;;  %v3023_v19 = vld [vmem:[%s3322_s18 + $0x24] sm:$0xf0]  ;;  %v2495_v26 = vor.u32 %v3035_v17, %v2494_v16  ;;  %v3084_v31 = vld [vmem:[%s3770_s6 + $0x178] sm:$0xff] }
  0x14   : > { %v2486_v20 = vld [vmem:[%s3316_s12] sm:$0xf]  ;;  %v3033_v21 = vld [vmem:[%s3316_s12 + $0x4] sm:$0xf0]  ;;  %v2543_v27 = vor.u32 %v3023_v19, %v2542_v18  ;;  %v3051_v32 = vld [vmem:[%s3770_s6 + $0xb0] sm:$0xff] }
  0x15   : > { %3127 = vmatpush.bf16.msra.mxu2 %v3042_v4  ;;  %720 = vmatpush.bf16.msra.mxu0 %v3042_v4  ;;  %v2534_v22 = vld [vmem:[%s3322_s18] sm:$0xf]  ;;  %v3021_v23 = vld [vmem:[%s3322_s18 + $0x4] sm:$0xf0]  ;;  %v2487_v28 = vor.u32 %v3033_v21, %v2486_v20  ;;  %v3063_v33 = vld [vmem:[%s3770_s6 + $0xf0] sm:$0xff] }
  0x16   : > { %3135 = vmatpush.bf16.msra.mxu3 %v3030_v5  ;;  %821 = vmatpush.bf16.msra.mxu1 %v3030_v5  ;;  %v2535_v29 = vor.u32 %v3021_v23, %v2534_v22  ;;  %v848_v34 = vld [vmem:[%s3322_s18] sm:$0xf]  ;;  %v850_v35 = vld [vmem:[%s3322_s18 + $0x8] sm:$0xf]  ;;  %v3075_v36 = vld [vmem:[%s3770_s6 + $0x130] sm:$0xff] }
  0x17   : > { %v3083_v37 = vld [vmem:[%s3770_s6 + $0x170] sm:$0xff]  ;;  %v1365_v38 = vld [vmem:[%s3354_s19] sm:$0xf]  ;;  %v3050_v39 = vld [vmem:[%s3770_s6 + $0xa8] sm:$0xff]  ;;  %v868_v42 = vshrl.u32 %v848_v34, 16  ;;  %v871_v43 = vshll.u32 %v848_v34, 16 }
  0x18   : > { %v3062_v40 = vld [vmem:[%s3770_s6 + $0xe8] sm:$0xff]  ;;  %v882_v44 = vshrl.u32 %v850_v35, 16  ;;  %v885_v45 = vshll.u32 %v850_v35, 16  ;;  %v3049_v47 = vld [vmem:[%s3770_s6 + $0xa0] sm:$0xff]  ;;  %v1382_v48 = vshrl.u32 %v1365_v38, 16  ;;  %v1385_v49 = vshll.u32 %v1365_v38, 16  ;;  %vm3433_vm2 = vmor %vm864_vm0, %vm865_vm1 }
  0x19   : > { %3128 = vmatpush.bf16.msra.mxu2 %v3041_v6  ;;  %721 = vmatpush.bf16.msra.mxu0 %v3041_v6  ;;  %v1367_v41 = vld [vmem:[%s3354_s19 + $0x8] sm:$0xf]  ;;  %v3061_v50 = vld [vmem:[%s3770_s6 + $0xe0] sm:$0xff]  ;;  %v2498_v51 = vld [vmem:[%s3316_s12 + $0x30] sm:$0xf]  ;;  %v870_v62 = vrot.slane %v868_v42, 4 }
  0x1a   : > { %3136 = vmatpush.bf16.msra.mxu3 %v3029_v7  ;;  %822 = vmatpush.bf16.msra.mxu1 %v3029_v7  ;;  %v3074_v46 = vld [vmem:[%s3770_s6 + $0x128] sm:$0xff]  ;;  %v1396_v53 = vshrl.u32 %v1367_v41, 16  ;;  %v1399_v54 = vshll.u32 %v1367_v41, 16  ;;  %v3036_v55 = vld [vmem:[%s3316_s12 + $0x34] sm:$0xf0]  ;;  %v3073_v58 = vld [vmem:[%s3770_s6 + $0x120] sm:$0xff] }
  0x1b   : > { %v3082_v52 = vld [vmem:[%s3770_s6 + $0x168] sm:$0xff]  ;;  %v2546_v56 = vld [vmem:[%s3322_s18 + $0x30] sm:$0xf]  ;;  %v3024_v57 = vld [vmem:[%s3322_s18 + $0x34] sm:$0xf0]  ;;  %v873_v63 = vrot.slane %v871_v43, 5 }
  0x1c   : > { %v2490_v59 = vld [vmem:[%s3316_s12 + $0x10] sm:$0xf]  ;;  %v3034_v60 = vld [vmem:[%s3316_s12 + $0x14] sm:$0xf0]  ;;  %v884_v0 = vrot.slane %v882_v44, 4  ;;  %v887_v1 = vrot.slane %v885_v45, 5 }
  0x1d   : > { %3129 = vmatpush.bf16.msra.mxu2 %v3040_v8  ;;  %722 = vmatpush.bf16.msra.mxu0 %v3040_v8  ;;  %v2538_v61 = vld [vmem:[%s3322_s18 + $0x10] sm:$0xf]  ;;  %v849_v2 = vld [vmem:[%s3322_s18 + $0x4] sm:$0x1]  ;;  %v851_v3 = vld [vmem:[%s3322_s18 + $0xc] sm:$0x1]  ;;  %v874_v16 = vor.u32 %v873_v63, %v870_v62  ;;  %v2491_v20 = vor.u32 %v3034_v60, %v2490_v59 }
  0x1e   : > { %3137 = vmatpush.bf16.msra.mxu3 %v3028_v9  ;;  %823 = vmatpush.bf16.msra.mxu1 %v3028_v9  ;;  %v1384_v4 = vrot.slane %v1382_v48, 4  ;;  %v1387_v5 = vrot.slane %v1385_v49, 5  ;;  %v3048_v6 = vld [vmem:[%s3770_s6 + $0x98] sm:$0xff]  ;;  %v3081_v8 = vld [vmem:[%s3770_s6 + $0x160] sm:$0xff]  ;;  %v1398_v9 = vrot.slane %v1396_v53, 4  ;;  %v877_v17 = vshll.u32 %v849_v2, 16 }
  0x1f   : > { %v3022_v7 = vld [vmem:[%s3322_s18 + $0x14] sm:$0xf0]  ;;  %v888_v18 = vor.u32 %v887_v1, %v884_v0  ;;  %v891_v19 = vshll.u32 %v851_v3, 16  ;;  %v3079_v42 = vld [vmem:[%s3770_s6 + $0x150] sm:$0xff]  ;;  %v3058_v48 = vld [vmem:[%s3770_s6 + $0xc8] sm:$0xff] }
  0x20   : > { %v2539_v21 = vor.u32 %v3022_v7, %v2538_v61  ;;  %v3072_v22 = vld [vmem:[%s3770_s6 + $0x118] sm:$0xff]  ;;  %v1369_v49 = vld [vmem:[%s3354_s19 + $0x10] sm:$0xf]  ;;  %v853_v59 = vld [vmem:[%s3322_s18 + $0x14] sm:$0x1] }
  0x21   : > { %3130 = vmatpush.bf16.msra.mxu2 %v3039_v10  ;;  %723 = vmatpush.bf16.msra.mxu0 %v3039_v10  ;;  %v1401_v10 = vrot.slane %v1399_v54, 5  ;;  %v3080_v23 = vld [vmem:[%s3770_s6 + $0x158] sm:$0xff]  ;;  %v889_v34 = vrot.slane %v888_v18, 4  ;;  %v893_v35 = vrot.slane %v891_v19, 5  ;;  %v3078_v54 = vld [vmem:[%s3770_s6 + $0x148] sm:$0xff]  ;;  %v3045_v63 = vld [vmem:[%s3770_s6 + $0x80] sm:$0xff] }
  0x22   : > { %3138 = vmatpush.bf16.msra.mxu3 %v3027_v11  ;;  %824 = vmatpush.bf16.msra.mxu1 %v3027_v11  ;;  %v2499_v11 = vor.u32 %v3036_v55, %v2498_v51  ;;  %v3070_v51 = vld [vmem:[%s3770_s6 + $0x108] sm:$0xff]  ;;  %v855_v60 = vld [vmem:[%s3322_s18 + $0x1c] sm:$0x1]  ;;  %v3057_v0 = vld [vmem:[%s3770_s6 + $0xc0] sm:$0xff]  ;;  %v1410_v1 = vshrl.u32 %v1369_v49, 16  ;;  %v1413_v2 = vshll.u32 %v1369_v49, 16 }
  0x23   : > { %v894_v53 = vsel %vm3433_vm2, %v889_v34, %v893_v35  ;;  %v3106_v49 = vld [vmem:[%s3770_s6 + $0x1e8] sm:$0xff] }
  0x24   : > { %v997_v7 = vunpack.c.l.b16 %v894_v53 }
  0x25   : > { %3131 = vmatpush.bf16.msra.mxu2 %v3038_v12  ;;  %724 = vmatpush.bf16.msra.mxu0 %v3038_v12  ;;  %v2547_v12 = vor.u32 %v3024_v57, %v2546_v56 }
  0x26   : > { %3139 = vmatpush.bf16.msra.mxu3 %v3026_v13  ;;  %825 = vmatpush.bf16.msra.mxu1 %v3026_v13  ;;  %v3060_v13 = vld [vmem:[%s3770_s6 + $0xd8] sm:$0xff] }
  0x29   : > { %3132 = vmatpush.bf16.msra.mxu2 %v3037_v14  ;;  %725 = vmatpush.bf16.msra.mxu0 %v3037_v14  ;;  %v1366_v14 = vld [vmem:[%s3354_s19 + $0x4] sm:$0x1] }
  0x2a   : > { %3140 = vmatpush.bf16.msra.mxu3 %v3025_v15  ;;  %826 = vmatpush.bf16.msra.mxu1 %v3025_v15  ;;  %v1368_v15 = vld [vmem:[%s3354_s19 + $0xc] sm:$0x1] }
  0x2c   : > { %736 = vmatmul.bf16.vlgmr.msra.gmra.mxu2 %v2495_v26  ;;  %726 = vmatmul.bf16.vlgmr.msra.gmra.mxu0 %v2487_v28  ;;  %v1402_v26 = vor.u32 %v1401_v10, %v1398_v9  ;;  %v852_v28 = vld [vmem:[%s3322_s18 + $0x10] sm:$0xf]  ;;  %v3108_v9 = vld [vmem:[%s3770_s6 + $0x1f8] sm:$0xff]  ;;  %v2646_v10 = vld [vmem:[%s3354_s19] sm:$0xf] }
  0x2d   : > { %1060 = vmatpush.bf16.msrb.mxu2 %v3052_v24  ;;  %837 = vmatmul.bf16.vlgmr.msra.gmra.mxu3 %v2543_v27  ;;  %v1388_v24 = vor.u32 %v1387_v5, %v1384_v4  ;;  %v1405_v27 = vshll.u32 %v1368_v15, 16  ;;  %v899_v38 = vshll.u32 %v852_v28, 16  ;;  %v3069_v5 = vld [vmem:[%s3770_s6 + $0x100] sm:$0xff]  ;;  %v3065_v15 = vld [vmem:[%s3474_s17 + $0x4] sm:$0xf0] }
  0x2e   : > { %1194 = vmatpush.bf16.msrb.mxu3 %v3064_v25  ;;  %827 = vmatmul.bf16.vlgmr.msra.gmra.mxu1 %v2535_v29  ;;  %v1391_v25 = vshll.u32 %v1366_v14, 16  ;;  %v854_v29 = vld [vmem:[%s3322_s18 + $0x18] sm:$0xf]  ;;  %v1403_v44 = vrot.slane %v1402_v26, 4  ;;  %v2710_v14 = vld [vmem:[%s3474_s17] sm:$0xf] }
  0x2f   : > { %1328 = vmatpush.bf16.msrb.mxu0 %v3076_v30  ;;  %1574 = vmatpush.bf16.msrb.mxu1 %v3084_v31  ;;  %v3047_v30 = vld [vmem:[%s3770_s6 + $0x90] sm:$0xff]  ;;  %v1407_v45 = vrot.slane %v1405_v27, 5  ;;  %v901_v56 = vrot.slane %v899_v38, 5 }
  0x30   : > { %v3059_v31 = vld [vmem:[%s3770_s6 + $0xd0] sm:$0xff]  ;;  %v1393_v43 = vrot.slane %v1391_v25, 5 }
  0x31   : > { %1061 = vmatpush.bf16.msrb.mxu2 %v3051_v32  ;;  %v875_v32 = vrot.slane %v874_v16, 4  ;;  %v3077_v16 = vld [vmem:[%s3770_s6 + $0x140] sm:$0xff]  ;;  %v3115_v38 = vld [vmem:[%s3770_s6 + $0x230] sm:$0xff] }
  0x32   : > { %1195 = vmatpush.bf16.msrb.mxu3 %v3063_v33  ;;  %v879_v33 = vrot.slane %v877_v17, 5 }
  0x33   : > { %1329 = vmatpush.bf16.msrb.mxu0 %v3075_v36  ;;  %1575 = vmatpush.bf16.msrb.mxu1 %v3083_v37  ;;  %v1389_v36 = vrot.slane %v1388_v24, 4  ;;  %v896_v37 = vshrl.u32 %v852_v28, 16  ;;  %v1370_v28 = vld [vmem:[%s3354_s19 + $0x14] sm:$0x1] }
  0x35   : > { %1062 = vmatpush.bf16.msrb.mxu2 %v3050_v39  ;;  %v910_v39 = vshrl.u32 %v854_v29, 16  ;;  %v898_v55 = vrot.slane %v896_v37, 4  ;;  %v1394_v57 = vsel %vm3433_vm2, %v1389_v36, %v1393_v43 }
  0x36   : > { %1196 = vmatpush.bf16.msrb.mxu3 %v3062_v40  ;;  %v3071_v40 = vld [vmem:[%s3770_s6 + $0x110] sm:$0xff]  ;;  %v1510_v17 = vunpack.c.l.b16 %v1394_v57 }
  0x37   : > { %1330 = vmatpush.bf16.msrb.mxu0 %v3074_v46  ;;  %1576 = vmatpush.bf16.msrb.mxu1 %v3082_v52  ;;  %v913_v46 = vshll.u32 %v854_v29, 16  ;;  %v880_v52 = vsel %vm3433_vm2, %v875_v32, %v879_v33  ;;  %v912_v61 = vrot.slane %v910_v39, 4  ;;  %v902_v19 = vor.u32 %v901_v56, %v898_v55  ;;  %v1372_v29 = vld [vmem:[%s3354_s19 + $0x1c] sm:$0x1]  ;;  %v3107_v33 = vld [vmem:[%s3770_s6 + $0x1f0] sm:$0xff] }
  0x38   : > { %v1433_v43 = vshll.u32 %v1372_v29, 16  ;;  %v1373_v55 = vld [vmem:[%s3354_s19 + $0x20] sm:$0xf] }
  0x39   : > { %1063 = vmatpush.bf16.msrb.mxu2 %v3049_v47  ;;  %v3046_v47 = vld [vmem:[%s3770_s6 + $0x88] sm:$0xff]  ;;  %v915_v62 = vrot.slane %v913_v46, 5  ;;  %v903_v35 = vrot.slane %v902_v19, 4 }
  0x3a   : > { %1197 = vmatpush.bf16.msrb.mxu3 %v3061_v50  ;;  %v1371_v50 = vld [vmem:[%s3354_s19 + $0x18] sm:$0xf]  ;;  %v858_v46 = vld [vmem:[%s3322_s18 + $0x28] sm:$0xf] }
  0x3b   : > { %1331 = vmatpush.bf16.msrb.mxu0 %v3073_v58  ;;  %1577 = vmatpush.bf16.msrb.mxu1 %v3081_v8  ;;  %v1408_v58 = vsel %vm3433_vm2, %v1403_v44, %v1407_v45  ;;  %v1424_v3 = vshrl.u32 %v1371_v50, 16  ;;  %v1427_v4 = vshll.u32 %v1371_v50, 16  ;;  %v3096_v8 = vld [vmem:[%s3770_s6 + $0x1b8] sm:$0xff]  ;;  %v3094_v44 = vld [vmem:[%s3770_s6 + $0x1a8] sm:$0xff]  ;;  %v856_v45 = vld [vmem:[%s3322_s18 + $0x20] sm:$0xf] }
  0x3c   : > { %741 = vmatmul.bf16.gmra.mxu2 %v2499_v11  ;;  %731 = vmatmul.bf16.gmra.mxu0 %v2491_v20  ;;  %v3053_v11 = vld [vmem:[%s3354_s19 + $0x4] sm:$0xf0]  ;;  %v1511_v18 = vunpack.c.l.b16 %v1408_v58  ;;  %v916_v20 = vor.u32 %v915_v62, %v912_v61  ;;  %v924_v56 = vshrl.u32 %v856_v45, 16  ;;  %v927_v57 = vshll.u32 %v856_v45, 16  ;;  %v3093_v61 = vld [vmem:[%s3770_s6 + $0x1a0] sm:$0xff] }
  0x3d   : > { %1064 = vmatpush.bf16.msrb.mxu2 %v3048_v6  ;;  %842 = vmatmul.bf16.gmra.mxu3 %v2547_v12  ;;  %v996_v6 = vunpack.c.l.b16 %v880_v52  ;;  %v905_v12 = vshll.u32 %v853_v59, 16  ;;  %v1426_v24 = vrot.slane %v1424_v3, 4  ;;  %v1429_v25 = vrot.slane %v1427_v4, 5  ;;  %v3114_v50 = vld [vmem:[%s3770_s6 + $0x228] sm:$0xff]  ;;  %v3054_v4 = vld [vmem:[%s3354_s19 + $0x14] sm:$0xf0] }
  0x3e   : > { %1198 = vmatpush.bf16.msrb.mxu3 %v3060_v13  ;;  %832 = vmatmul.bf16.gmra.mxu1 %v2539_v21  ;;  %v919_v13 = vshll.u32 %v855_v60, 16  ;;  %v3116_v21 = vld [vmem:[%s3770_s6 + $0x238] sm:$0xff]  ;;  %v2647_v27 = vor.u32 %v3053_v11, %v2646_v10  ;;  %v1518_v34 = vpack.c.b16 %v1511_v18, %v1510_v17  ;;  %v917_v36 = vrot.slane %v916_v20, 4  ;;  %v1375_v60 = vld [vmem:[%s3354_s19 + $0x28] sm:$0xf] }
  0x3f   : > { %1332 = vmatpush.bf16.msrb.mxu0 %v3072_v22  ;;  %1578 = vmatpush.bf16.msrb.mxu1 %v3080_v23  ;;  %v1412_v22 = vrot.slane %v1410_v1, 4  ;;  %v1415_v23 = vrot.slane %v1413_v2, 5  ;;  %v1004_v26 = vpack.c.b16 %v997_v7, %v996_v6  ;;  %v907_v32 = vrot.slane %v905_v12, 5  ;;  %v3105_v1 = vld [vmem:[%s3770_s6 + $0x1e0] sm:$0xff]  ;;  %v2714_v10 = vld [vmem:[%s3474_s17 + $0x10] sm:$0xf] }
  0x40   : > { %v921_v37 = vrot.slane %v919_v13, 5  ;;  %v938_v58 = vshrl.u32 %v858_v46, 16  ;;  %v941_v59 = vshll.u32 %v858_v46, 16  ;;  %v1438_v2 = vshrl.u32 %v1373_v55, 16  ;;  %v3113_v7 = vld [vmem:[%s3770_s6 + $0x220] sm:$0xff]  ;;  %v3092_v17 = vld [vmem:[%s3770_s6 + $0x198] sm:$0xff] }
  0x41   : > { %1065 = vmatpush.bf16.msrb.mxu2 %v3047_v30  ;;  %v2711_v30 = vor.u32 %v3065_v15, %v2710_v14  ;;  %v1416_v39 = vor.u32 %v1415_v23, %v1412_v22  ;;  %v1441_v3 = vshll.u32 %v1373_v55, 16  ;;  %v926_v11 = vrot.slane %v924_v56, 4  ;;  %v857_v15 = vld [vmem:[%s3322_s18 + $0x24] sm:$0x1]  ;;  %v3066_v18 = vld [vmem:[%s3474_s17 + $0x14] sm:$0xf0] }
  0x42   : > { %1199 = vmatpush.bf16.msrb.mxu3 %v3059_v31  ;;  %v3095_v31 = vld [vmem:[%s3770_s6 + $0x1b0] sm:$0xff]  ;;  %v929_v12 = vrot.slane %v927_v57, 5  ;;  %v940_v13 = vrot.slane %v938_v58, 4  ;;  %v943_v14 = vrot.slane %v941_v59, 5  ;;  %v1440_v22 = vrot.slane %v1438_v2, 4  ;;  %v3110_v57 = vld [vmem:[%s3770_s6 + $0x208] sm:$0xff] }
  0x43   : > { %1333 = vmatpush.bf16.msrb.mxu0 %v3071_v40  ;;  %1579 = vmatpush.bf16.msrb.mxu1 %v3079_v42  ;;  %v1419_v40 = vshll.u32 %v1370_v28, 16  ;;  %v1430_v42 = vor.u32 %v1429_v25, %v1426_v24  ;;  %v1443_v23 = vrot.slane %v1441_v3, 5  ;;  %v1377_v58 = vld [vmem:[%s3354_s19 + $0x30] sm:$0xf]  ;;  %v3089_v2 = vld [vmem:[%s3770_s6 + $0x180] sm:$0xff] }
  0x44   : > { %v930_v29 = vor.u32 %v929_v12, %v926_v11  ;;  %v3101_v3 = vld [vmem:[%s3770_s6 + $0x1c0] sm:$0xff] }
  0x45   : > { %1066 = vmatpush.bf16.msrb.mxu2 %v3046_v47  ;;  %v908_v47 = vsel %vm3433_vm2, %v903_v35, %v907_v32  ;;  %v1421_v52 = vrot.slane %v1419_v40, 5  ;;  %v1431_v53 = vrot.slane %v1430_v42, 4  ;;  %v2715_v35 = vor.u32 %v3066_v18, %v2714_v10  ;;  %v3109_v10 = vld [vmem:[%s3770_s6 + $0x200] sm:$0xff] }
  0x46   : > { %1200 = vmatpush.bf16.msrb.mxu3 %v3058_v48  ;;  %v922_v48 = vsel %vm3433_vm2, %v917_v36, %v921_v37  ;;  %v998_v62 = vunpack.c.l.b16 %v908_v47  ;;  %v3091_v36 = vld [vmem:[%s3770_s6 + $0x190] sm:$0xff] }
  0x47   : > { %1334 = vmatpush.bf16.msrb.mxu0 %v3070_v51  ;;  %1580 = vmatpush.bf16.msrb.mxu1 %v3078_v54  ;;  %v1417_v51 = vrot.slane %v1416_v39, 4  ;;  %v1435_v54 = vrot.slane %v1433_v43, 5  ;;  %v1444_v39 = vor.u32 %v1443_v23, %v1440_v22  ;;  %v861_v23 = vld [vmem:[%s3322_s18 + $0x34] sm:$0x1] }
  0x49   : > { %1067 = vmatpush.bf16.msrb.mxu2 %v3045_v63  ;;  %v999_v63 = vunpack.c.l.b16 %v922_v48  ;;  %v1436_v6 = vsel %vm3433_vm2, %v1431_v53, %v1435_v54  ;;  %v3090_v48 = vld [vmem:[%s3770_s6 + $0x188] sm:$0xff] }
  0x4a   : > { %1201 = vmatpush.bf16.msrb.mxu3 %v3057_v0  ;;  %v2650_v0 = vld [vmem:[%s3354_s19 + $0x10] sm:$0xf]  ;;  %v1513_v20 = vunpack.c.l.b16 %v1436_v6  ;;  %v3102_v53 = vld [vmem:[%s3770_s6 + $0x1c8] sm:$0xff] }
  0x4b   : > { %1335 = vmatpush.bf16.msrb.mxu0 %v3069_v5  ;;  %1581 = vmatpush.bf16.msrb.mxu1 %v3077_v16  ;;  %v1422_v5 = vsel %vm3433_vm2, %v1417_v51, %v1421_v52  ;;  %v859_v16 = vld [vmem:[%s3322_s18 + $0x2c] sm:$0x1]  ;;  %v1005_v24 = vpack.c.b16 %v999_v63, %v998_v62  ;;  %v2651_v25 = vor.u32 %v3054_v4, %v2650_v0  ;;  %v860_v51 = vld [vmem:[%s3322_s18 + $0x30] sm:$0xf]  ;;  %v862_v52 = vld [vmem:[%s3322_s18 + $0x38] sm:$0xf] }
  0x4c   : > { %1068 = vmatmul.bf16.vlgmr.msrb.gmra.mxu2 %v1004_v26  ;;  %v1512_v19 = vunpack.c.l.b16 %v1422_v5  ;;  %v3112_v26 = vld [vmem:[%s3770_s6 + $0x218] sm:$0xff]  ;;  %v947_v32 = vshll.u32 %v859_v16, 16  ;;  %v952_v62 = vshrl.u32 %v860_v51, 16  ;;  %v955_v63 = vshll.u32 %v860_v51, 16  ;;  %v3067_v16 = vld [vmem:[%s3474_s17 + $0x24] sm:$0xf0] }
  0x4d   : > { %1708 = vmatpush.bf16.msra.mxu2 %v3096_v8  ;;  %1202 = vmatmul.bf16.vlgmr.msrb.gmra.mxu3 %v2647_v27  ;;  %v1452_v8 = vshrl.u32 %v1375_v60, 16  ;;  %v966_v0 = vshrl.u32 %v862_v52, 16  ;;  %v1466_v4 = vshrl.u32 %v1377_v58, 16  ;;  %v1469_v5 = vshll.u32 %v1377_v58, 16 }
  0x4e   : > { %1842 = vmatpush.bf16.msra.mxu3 %v3108_v9  ;;  %1336 = vmatmul.bf16.vlgmr.msrb.gmra.mxu0 %v2711_v30  ;;  %v1455_v9 = vshll.u32 %v1375_v60, 16  ;;  %v933_v30 = vshll.u32 %v857_v15, 16  ;;  %v1519_v37 = vpack.c.b16 %v1513_v20, %v1512_v19  ;;  %v949_v47 = vrot.slane %v947_v32, 5  ;;  %v2718_v15 = vld [vmem:[%s3474_s17 + $0x20] sm:$0xf] }
  0x4f   : > { %2088 = vmatpush.bf16.msra.mxu0 %v3116_v21  ;;  %1582 = vmatmul.bf16.vlgmr.msrb.gmra.mxu1 %v1518_v34  ;;  %v3104_v21 = vld [vmem:[%s3770_s6 + $0x1d8] sm:$0xff]  ;;  %v1454_v27 = vrot.slane %v1452_v8, 4  ;;  %v1376_v34 = vld [vmem:[%s3354_s19 + $0x2c] sm:$0x1]  ;;  %v957_v18 = vrot.slane %v955_v63, 5  ;;  %v968_v19 = vrot.slane %v966_v0, 4  ;;  %v2719_v32 = vor.u32 %v3067_v16, %v2718_v15 }
  0x50   : > { %v1457_v28 = vrot.slane %v1455_v9, 5  ;;  %v1461_v43 = vshll.u32 %v1376_v34, 16  ;;  %v935_v45 = vrot.slane %v933_v30, 5  ;;  %v2658_v0 = vld [vmem:[%s3354_s19 + $0x30] sm:$0xf] }
  0x51   : > { %1709 = vmatpush.bf16.msra.mxu2 %v3095_v31  ;;  %v944_v31 = vor.u32 %v943_v14, %v940_v13  ;;  %v2654_v13 = vld [vmem:[%s3354_s19 + $0x20] sm:$0xf]  ;;  %v3055_v14 = vld [vmem:[%s3354_s19 + $0x24] sm:$0xf0] }
  0x52   : > { %1843 = vmatpush.bf16.msra.mxu3 %v3107_v33  ;;  %v1374_v33 = vld [vmem:[%s3354_s19 + $0x24] sm:$0x1]  ;;  %v1458_v42 = vor.u32 %v1457_v28, %v1454_v27  ;;  %v1463_v56 = vrot.slane %v1461_v43, 5  ;;  %v1378_v27 = vld [vmem:[%s3354_s19 + $0x34] sm:$0x1] }
  0x53   : > { %2089 = vmatpush.bf16.msra.mxu0 %v3115_v38  ;;  %v3103_v38 = vld [vmem:[%s3770_s6 + $0x1d0] sm:$0xff]  ;;  %v1447_v40 = vshll.u32 %v1374_v33, 16  ;;  %v945_v46 = vrot.slane %v944_v31, 4  ;;  %v2655_v31 = vor.u32 %v3055_v14, %v2654_v13  ;;  %v1380_v33 = vld [vmem:[%s3354_s19 + $0x3c] sm:$0x1] }
  0x54   : > { %v1459_v55 = vrot.slane %v1458_v42, 4  ;;  %v1489_v43 = vshll.u32 %v1380_v33, 16  ;;  %v3085_v33 = vld [vmem:[%s3604_s21 + $0x4] sm:$0xf0] }
  0x55   : > { %1710 = vmatpush.bf16.msra.mxu2 %v3094_v44  ;;  %v931_v44 = vrot.slane %v930_v29, 4  ;;  %v1449_v54 = vrot.slane %v1447_v40, 5  ;;  %v950_v60 = vsel %vm3433_vm2, %v945_v46, %v949_v47  ;;  %v1475_v40 = vshll.u32 %v1378_v27, 16 }
  0x56   : > { %1844 = vmatpush.bf16.msra.mxu3 %v3106_v49  ;;  %v3111_v49 = vld [vmem:[%s3770_s6 + $0x210] sm:$0xff]  ;;  %v1001_v12 = vunpack.c.l.b16 %v950_v60 }
  0x57   : > { %2090 = vmatpush.bf16.msra.mxu0 %v3114_v50  ;;  %v1445_v50 = vrot.slane %v1444_v39, 4  ;;  %v936_v59 = vsel %vm3433_vm2, %v931_v44, %v935_v45 }
  0x58   : > { %v1000_v11 = vunpack.c.l.b16 %v936_v59 }
  0x59   : > { %1711 = vmatpush.bf16.msra.mxu2 %v3093_v61  ;;  %v1379_v61 = vld [vmem:[%s3354_s19 + $0x38] sm:$0xf]  ;;  %v1450_v6 = vsel %vm3433_vm2, %v1445_v50, %v1449_v54  ;;  %v1879_v50 = vld [vmem:[%s3604_s21] sm:$0xf] }
  0x5a   : > { %1845 = vmatpush.bf16.msra.mxu3 %v3105_v1  ;;  %v969_v1 = vshll.u32 %v862_v52, 16  ;;  %v1480_v8 = vshrl.u32 %v1379_v61, 16  ;;  %v1483_v9 = vshll.u32 %v1379_v61, 16  ;;  %v1006_v30 = vpack.c.b16 %v1001_v12, %v1000_v11  ;;  %v1882_v11 = vld [vmem:[%s3604_s21 + $0xc] sm:$0x1] }
  0x5b   : > { %2091 = vmatpush.bf16.msra.mxu0 %v3113_v7  ;;  %v1464_v7 = vsel %vm3433_vm2, %v1459_v55, %v1463_v56  ;;  %v1491_v52 = vrot.slane %v1489_v43, 5  ;;  %v1896_v56 = vshrl.u32 %v1879_v50, 16  ;;  %v1899_v58 = vshll.u32 %v1879_v50, 16  ;;  %v1884_v43 = vld [vmem:[%s3604_s21 + $0x14] sm:$0x1] }
  0x5c   : > { %1073 = vmatmul.bf16.gmra.mxu2 %v1005_v24  ;;  %v971_v20 = vrot.slane %v969_v1, 5  ;;  %v1515_v22 = vunpack.c.l.b16 %v1464_v7  ;;  %v863_v24 = vld [vmem:[%s3322_s18 + $0x3c] sm:$0x1]  ;;  %v1482_v28 = vrot.slane %v1480_v8, 4  ;;  %v1485_v29 = vrot.slane %v1483_v9, 5 }
  0x5d   : > { %1712 = vmatpush.bf16.msra.mxu2 %v3092_v17  ;;  %1207 = vmatmul.bf16.gmra.mxu3 %v2651_v25  ;;  %v954_v17 = vrot.slane %v952_v62, 4  ;;  %v1468_v25 = vrot.slane %v1466_v4, 4  ;;  %v3056_v1 = vld [vmem:[%s3354_s19 + $0x34] sm:$0xf0]  ;;  %v1880_v7 = vld [vmem:[%s3604_s21 + $0x4] sm:$0x1] }
  0x5e   : > { %1846 = vmatpush.bf16.msra.mxu3 %v3104_v21  ;;  %1341 = vmatmul.bf16.gmra.mxu0 %v2715_v35  ;;  %v1514_v21 = vunpack.c.l.b16 %v1450_v6  ;;  %v961_v35 = vshll.u32 %v861_v23, 16  ;;  %v1486_v42 = vor.u32 %v1485_v29, %v1482_v28  ;;  %v1901_v8 = vrot.slane %v1899_v58, 5 }
  0x5f   : > { %2092 = vmatpush.bf16.msra.mxu0 %v3112_v26  ;;  %1587 = vmatmul.bf16.gmra.mxu1 %v1519_v37  ;;  %v1471_v26 = vrot.slane %v1469_v5, 5  ;;  %v958_v34 = vor.u32 %v957_v18, %v954_v17  ;;  %v975_v37 = vshll.u32 %v863_v24, 16  ;;  %v1898_v5 = vrot.slane %v1896_v56, 4  ;;  %v1887_v56 = vld [vmem:[%s3604_s21 + $0x20] sm:$0xf] }
  0x60   : > { %v963_v45 = vrot.slane %v961_v35, 5  ;;  %v1487_v51 = vrot.slane %v1486_v42, 4  ;;  %v2659_v13 = vor.u32 %v3056_v1, %v2658_v0  ;;  %v1905_v15 = vshll.u32 %v1880_v7, 16  ;;  %v3097_v35 = vld [vmem:[%s3628_s22 + $0x4] sm:$0xf0] }
  0x61   : > { %1713 = vmatpush.bf16.msra.mxu2 %v3091_v36  ;;  %v972_v36 = vor.u32 %v971_v20, %v968_v19  ;;  %v1472_v39 = vor.u32 %v1471_v26, %v1468_v25  ;;  %v959_v44 = vrot.slane %v958_v34, 4  ;;  %v977_v47 = vrot.slane %v975_v37, 5  ;;  %v1883_v20 = vld [vmem:[%s3604_s21 + $0x10] sm:$0xf]  ;;  %v2886_v34 = vld [vmem:[%s3628_s22] sm:$0xf] }
  0x62   : > { %1847 = vmatpush.bf16.msra.mxu3 %v3103_v38  ;;  %v1520_v38 = vpack.c.b16 %v1515_v22, %v1514_v21  ;;  %v1492_v61 = vsel %vm3433_vm2, %v1487_v51, %v1491_v52  ;;  %v1902_v17 = vor.u32 %v1901_v8, %v1898_v5  ;;  %v1919_v19 = vshll.u32 %v1882_v11, 16  ;;  %v1885_v21 = vld [vmem:[%s3604_s21 + $0x18] sm:$0xf]  ;;  %v2826_v0 = vld [vmem:[%s3604_s21 + $0x10] sm:$0xf] }
  0x63   : > { %2093 = vmatpush.bf16.msra.mxu0 %v3111_v49  ;;  %v973_v46 = vrot.slane %v972_v36, 4  ;;  %v1477_v49 = vrot.slane %v1475_v40, 5  ;;  %v964_v54 = vsel %vm3433_vm2, %v959_v44, %v963_v45  ;;  %v1517_v6 = vunpack.c.l.b16 %v1492_v61  ;;  %v1886_v44 = vld [vmem:[%s3604_s21 + $0x1c] sm:$0x1]  ;;  %v3086_v1 = vld [vmem:[%s3604_s21 + $0x14] sm:$0xf0] }
  0x64   : > { %v1002_v62 = vunpack.c.l.b16 %v964_v54  ;;  %v1903_v22 = vrot.slane %v1902_v17, 4  ;;  %v1907_v23 = vrot.slane %v1905_v15, 5  ;;  %v1921_v25 = vrot.slane %v1919_v19, 5  ;;  %v3098_v5 = vld [vmem:[%s3628_s22 + $0x14] sm:$0xf0] }
  0x65   : > { %1714 = vmatpush.bf16.msra.mxu2 %v3090_v48  ;;  %v1473_v48 = vrot.slane %v1472_v39, 4  ;;  %v978_v55 = vsel %vm3433_vm2, %v973_v46, %v977_v47  ;;  %v1924_v26 = vshrl.u32 %v1883_v20, 16  ;;  %v1927_v27 = vshll.u32 %v1883_v20, 16  ;;  %v1890_v11 = vld [vmem:[%s3604_s21 + $0x2c] sm:$0x1] }
  0x66   : > { %1848 = vmatpush.bf16.msra.mxu3 %v3102_v53  ;;  %v1881_v53 = vld [vmem:[%s3604_s21 + $0x8] sm:$0xf]  ;;  %v1003_v63 = vunpack.c.l.b16 %v978_v55  ;;  %v1938_v28 = vshrl.u32 %v1885_v21, 16  ;;  %v1941_v29 = vshll.u32 %v1885_v21, 16  ;;  %v2887_v46 = vor.u32 %v3097_v35, %v2886_v34 }
  0x67   : > { %2094 = vmatpush.bf16.msra.mxu0 %v3110_v57  ;;  %v1478_v57 = vsel %vm3433_vm2, %v1473_v48, %v1477_v49  ;;  %v1910_v59 = vshrl.u32 %v1881_v53, 16  ;;  %v1913_v60 = vshll.u32 %v1881_v53, 16  ;;  %v1926_v36 = vrot.slane %v1924_v26, 4  ;;  %v3099_v34 = vld [vmem:[%s3628_s22 + $0x24] sm:$0xf0] }
  0x68   : > { %v1516_v4 = vunpack.c.l.b16 %v1478_v57  ;;  %v1007_v12 = vpack.c.b16 %v1003_v63, %v1002_v62  ;;  %v1929_v37 = vrot.slane %v1927_v27, 5  ;;  %v1943_v39 = vrot.slane %v1941_v29, 5  ;;  %v1889_v57 = vld [vmem:[%s3604_s21 + $0x28] sm:$0xf] }
  0x69   : > { %1715 = vmatpush.bf16.msra.mxu2 %v3089_v2  ;;  %v2722_v2 = vld [vmem:[%s3474_s17 + $0x30] sm:$0xf]  ;;  %v1912_v9 = vrot.slane %v1910_v59, 4  ;;  %v1933_v48 = vshll.u32 %v1884_v43, 16  ;;  %v1947_v50 = vshll.u32 %v1886_v44, 16  ;;  %v1955_v61 = vshll.u32 %v1887_v56, 16 }
  0x6a   : > { %1849 = vmatpush.bf16.msra.mxu3 %v3101_v3  ;;  %v3068_v3 = vld [vmem:[%s3474_s17 + $0x34] sm:$0xf0]  ;;  %v1521_v16 = vpack.c.b16 %v1517_v6, %v1516_v4  ;;  %v1930_v47 = vor.u32 %v1929_v37, %v1926_v36  ;;  %v1966_v62 = vshrl.u32 %v1889_v57, 16  ;;  %v1969_v63 = vshll.u32 %v1889_v57, 16  ;;  %v1894_v43 = vld [vmem:[%s3604_s21 + $0x3c] sm:$0x1] }
  0x6b   : > { %2095 = vmatpush.bf16.msra.mxu0 %v3109_v10  ;;  %v1915_v10 = vrot.slane %v1913_v60, 5  ;;  %v2723_v14 = vor.u32 %v3068_v3, %v2722_v2  ;;  %v1935_v53 = vrot.slane %v1933_v48, 5  ;;  %v1949_v55 = vrot.slane %v1947_v50, 5  ;;  %v2890_v2 = vld [vmem:[%s3628_s22 + $0x10] sm:$0xf] }
  0x6c   : > { %1078 = vmatmul.bf16.gmra.mxu2 %v1006_v30  ;;  %v1908_v30 = vsel %vm3433_vm2, %v1903_v22, %v1907_v23  ;;  %v1931_v52 = vrot.slane %v1930_v47, 4  ;;  %v1952_v60 = vshrl.u32 %v1887_v56, 16  ;;  %v1957_v7 = vrot.slane %v1955_v61, 5  ;;  %v1891_v23 = vld [vmem:[%s3604_s21 + $0x30] sm:$0xf] }
  0x6d   : > { %1212 = vmatmul.bf16.gmra.mxu3 %v2655_v31  ;;  %v1916_v18 = vor.u32 %v1915_v10, %v1912_v9  ;;  %v2024_v40 = vunpack.c.l.b16 %v1908_v30  ;;  %v1968_v8 = vrot.slane %v1966_v62, 4  ;;  %v1971_v9 = vrot.slane %v1969_v63, 5  ;;  %v1888_v10 = vld [vmem:[%s3604_s21 + $0x24] sm:$0x1]  ;;  %v2834_v62 = vld [vmem:[%s3604_s21 + $0x30] sm:$0xf] }
  0x6e   : > { %1346 = vmatmul.bf16.gmra.mxu0 %v2719_v32  ;;  %v2822_v32 = vld [vmem:[%s3604_s21] sm:$0xf]  ;;  %v1936_v58 = vsel %vm3433_vm2, %v1931_v52, %v1935_v53  ;;  %v1954_v6 = vrot.slane %v1952_v60, 4  ;;  %v1980_v27 = vshrl.u32 %v1891_v23, 16  ;;  %v3088_v63 = vld [vmem:[%s3604_s21 + $0x34] sm:$0xf0] }
  0x6f   : > { %1592 = vmatmul.bf16.gmra.mxu1 %v1520_v38  ;;  %v1917_v24 = vrot.slane %v1916_v18, 4  ;;  %v1940_v38 = vrot.slane %v1938_v28, 4  ;;  %v2823_v45 = vor.u32 %v3085_v33, %v2822_v32  ;;  %v2026_v3 = vunpack.c.l.b16 %v1936_v58  ;;  %v3087_v32 = vld [vmem:[%s3604_s21 + $0x24] sm:$0xf0]  ;;  %v2894_v33 = vld [vmem:[%s3628_s22 + $0x20] sm:$0xf] }
  0x70   : > { %v1958_v15 = vor.u32 %v1957_v7, %v1954_v6  ;;  %v1972_v17 = vor.u32 %v1971_v9, %v1968_v8  ;;  %v1975_v18 = vshll.u32 %v1890_v11, 16  ;;  %v1983_v28 = vshll.u32 %v1891_v23, 16 }
  0x71   : > { %v1922_v31 = vsel %vm3433_vm2, %v1917_v24, %v1921_v25  ;;  %v1944_v49 = vor.u32 %v1943_v39, %v1940_v38  ;;  %v1893_v24 = vld [vmem:[%s3604_s21 + $0x38] sm:$0xf]  ;;  %v1982_v37 = vrot.slane %v1980_v27, 4  ;;  %v2835_v7 = vor.u32 %v3088_v63, %v2834_v62  ;;  %v3122_v27 = vld [vmem:[%s3772_s8 + $0x28] sm:$0xff] }
  0x72   : > { %v2025_v42 = vunpack.c.l.b16 %v1922_v31  ;;  %v1959_v19 = vrot.slane %v1958_v15, 4  ;;  %v1973_v21 = vrot.slane %v1972_v17, 4  ;;  %v1977_v22 = vrot.slane %v1975_v18, 5  ;;  %v2830_v31 = vld [vmem:[%s3604_s21 + $0x20] sm:$0xf] }
  0x73   : > { %v1945_v54 = vrot.slane %v1944_v49, 4  ;;  %v1994_v29 = vshrl.u32 %v1893_v24, 16  ;;  %v1997_v30 = vshll.u32 %v1893_v24, 16  ;;  %v1985_v38 = vrot.slane %v1983_v28, 5 }
  0x74   : > { %v2032_v51 = vpack.c.b16 %v2025_v42, %v2024_v40  ;;  %v1978_v26 = vsel %vm3433_vm2, %v1973_v21, %v1977_v22  ;;  %v1892_v42 = vld [vmem:[%s3604_s21 + $0x34] sm:$0x1]  ;;  %v2831_v44 = vor.u32 %v3087_v32, %v2830_v31 }
  0x75   : > { %v1950_v59 = vsel %vm3433_vm2, %v1945_v54, %v1949_v55  ;;  %v2029_v36 = vunpack.c.l.b16 %v1978_v26  ;;  %v1996_v39 = vrot.slane %v1994_v29, 4  ;;  %v1999_v40 = vrot.slane %v1997_v30, 5 }
  0x76   : > { %v2027_v4 = vunpack.c.l.b16 %v1950_v59  ;;  %v1986_v48 = vor.u32 %v1985_v38, %v1982_v37  ;;  %v1989_v49 = vshll.u32 %v1892_v42, 16  ;;  %v3120_v42 = vld [vmem:[%s3772_s8 + $0x18] sm:$0xff] }
  0x77   : > { %v2000_v50 = vor.u32 %v1999_v40, %v1996_v39 }
  0x78   : > { %v1987_v52 = vrot.slane %v1986_v48, 4  ;;  %v1991_v53 = vrot.slane %v1989_v49, 5 }
  0x79   : > { %v2001_v54 = vrot.slane %v2000_v50, 4 }
  0x7a   : > { %v1992_v60 = vsel %vm3433_vm2, %v1987_v52, %v1991_v53 }
  0x7c   : > { %1083 = vmatmul.bf16.gmra.mxu2 %v1007_v12  ;;  %v2827_v12 = vor.u32 %v3086_v1, %v2826_v0  ;;  %v2898_v0 = vld [vmem:[%s3628_s22 + $0x30] sm:$0xf]  ;;  %v3100_v1 = vld [vmem:[%s3628_s22 + $0x34] sm:$0xf0] }
  0x7d   : > { %1217 = vmatmul.bf16.gmra.mxu3 %v2659_v13  ;;  %v2891_v13 = vor.u32 %v3098_v5, %v2890_v2  ;;  %v2030_v2 = vunpack.c.l.b16 %v1992_v60  ;;  %v2899_v8 = vor.u32 %v3100_v1, %v2898_v0 }
  0x7e   : > { %1351 = vmatmul.bf16.gmra.mxu0 %v2723_v14  ;;  %v2033_v14 = vpack.c.b16 %v2027_v4, %v2026_v3 }
  0x7f   : > { %1597 = vmatmul.bf16.gmra.mxu1 %v1521_v16  ;;  %v1961_v16 = vshll.u32 %v1888_v10, 16 }
  0x81   : > { %v1963_v20 = vrot.slane %v1961_v16, 5 }
  0x83   : > { %v1964_v25 = vsel %vm3433_vm2, %v1959_v19, %v1963_v20  ;;  %v3123_v20 = vld [vmem:[%s3772_s8 + $0x30] sm:$0xff] }
  0x84   : > { %v2028_v35 = vunpack.c.l.b16 %v1964_v25 }
  0x8c   : > { %1716 = vmatmul.bf16.vlgmr.msra.gmra.mxu2 %v2823_v45  ;;  %v2895_v45 = vor.u32 %v3099_v34, %v2894_v33  ;;  %v3121_v33 = vld [vmem:[%s3772_s8 + $0x20] sm:$0xff] }
  0x8d   : > { %1850 = vmatmul.bf16.vlgmr.msra.gmra.mxu3 %v2887_v46  ;;  %v2034_v46 = vpack.c.b16 %v2029_v36, %v2028_v35 }
  0x8e   : > { %2096 = vmatmul.bf16.vlgmr.msra.gmra.mxu0 %v2032_v51  ;;  %v2003_v51 = vshll.u32 %v1894_v43, 16 }
  0x90   : > { %v2005_v55 = vrot.slane %v2003_v51, 5 }
  0x92   : > { %v2006_v61 = vsel %vm3433_vm2, %v2001_v54, %v2005_v55 }
  0x93   : > { %v2031_v3 = vunpack.c.l.b16 %v2006_v61 }
  0x95   : > { %v2035_v9 = vpack.c.b16 %v2031_v3, %v2030_v2 }
  0x9c   : > { %1721 = vmatmul.bf16.gmra.mxu2 %v2827_v12 }
  0x9d   : > { %1855 = vmatmul.bf16.gmra.mxu3 %v2891_v13 }
  0x9e   : > { %2101 = vmatmul.bf16.gmra.mxu0 %v2033_v14  ;;  %v3124_v14 = vld [vmem:[%s3772_s8 + $0x38] sm:$0xff] }
  0x9f   : > { %2217 = vmatpush.bf16.msra.mxu1 %v3124_v14 }
  0xa3   : > { %2218 = vmatpush.bf16.msra.mxu1 %v3123_v20 }
  0xa7   : > { %2219 = vmatpush.bf16.msra.mxu1 %v3122_v27 }
  0xa9   : > { %v727_v47 = vpop.f32.mrf.mxu0 }
  0xab   : > { %v828_v18 = vpop.f32.mrf.mxu1  ;;  %2220 = vmatpush.bf16.msra.mxu1 %v3121_v33 }
  0xac   : > { %1726 = vmatmul.bf16.gmra.mxu2 %v2831_v44  ;;  %v829_v21 = vadd.f32 %v828_v18, %v727_v47  ;;  %v3119_v47 = vld [vmem:[%s3772_s8 + $0x10] sm:$0xff] }
  0xad   : > { %1860 = vmatmul.bf16.gmra.mxu3 %v2895_v45 }
  0xae   : > { %2106 = vmatmul.bf16.gmra.mxu0 %v2034_v46 }
  0xaf   : > { %v737_v56 = vpop.f32.mrf.mxu2  ;;  %2221 = vmatpush.bf16.msra.mxu1 %v3120_v42 }
  0xb0   : > { %v838_v57 = vpop.f32.mrf.mxu3 }
  0xb1   : > { %v3664_v58 = vadd.f32 %v838_v57, %v737_v56  ;;  %v3666_v59 = vpop.f32.mrf.mxu0  ;;  %v3118_v57 = vld [vmem:[%s3772_s8 + $0x8] sm:$0xff] }
  0xb3   : > { %v830_v28 = vpop.f32.mrf.mxu1  ;;  %2222 = vmatpush.bf16.msra.mxu1 %v3119_v47 }
  0xb7   : > { %v739_v4 = vpop.f32.mrf.mxu2  ;;  %2223 = vmatpush.bf16.msra.mxu1 %v3118_v57 }
  0xb8   : > { %v840_v5 = vpop.f32.mrf.mxu3 }
  0xb9   : > { %v3676_v6 = vadd.f32 %v840_v5, %v739_v4  ;;  %v732_v10 = vpop.f32.mrf.mxu0 }
  0xbb   : > { %v833_v34 = vpop.f32.mrf.mxu1 }
  0xbc   : > { %1731 = vmatmul.bf16.gmra.mxu2 %v2835_v7  ;;  %v834_v35 = vadd.f32 %v833_v34, %v732_v10 }
  0xbd   : > { %1865 = vmatmul.bf16.gmra.mxu3 %v2899_v8  ;;  %v831_v8 = vadd.f32 %v830_v28, %v3666_v59  ;;  %v3728_v59 = vld [vmem:[%s3771_s7] ss:$0 sm:$0xff] }
  0xbe   : > { %2111 = vmatmul.bf16.gmra.mxu0 %v2035_v9 }
  0xbf   : > { %v742_v11 = vpop.f32.mrf.mxu2 }
  0xc0   : > { %v843_v41 = vpop.f32.mrf.mxu3 }
  0xc1   : > { %v844_v12 = vadd.f32 %v843_v41, %v742_v11  ;;  %v3678_v13 = vpop.f32.mrf.mxu0 }
  0xc3   : > { %v835_v53 = vpop.f32.mrf.mxu1 }
  0xc7   : > { %v744_v15 = vpop.f32.mrf.mxu2 }
  0xc8   : > { %v845_v16 = vpop.f32.mrf.mxu3 }
  0xc9   : > { %v3683_v17 = vadd.f32 %v845_v16, %v744_v15 }
  0xcb   : > { %v1337_v19 = vpop.f32.mrf.mxu0 }
  0xcc   : > { %v1583_v61 = vpop.f32.mrf.mxu1 }
  0xcf   : > { %v1069_v22 = vpop.f32.mrf.mxu2 }
  0xd0   : > { %v1203_v23 = vpop.f32.mrf.mxu3  ;;  %v1089_v24 = vadd.f32 %v1069_v22, %v829_v21 }
  0xd2   : > { %v1223_v25 = vadd.f32 %v1203_v23, %v1089_v24  ;;  %v836_v24 = vadd.f32 %v835_v53, %v3678_v13 }
  0xd3   : > { %v1339_v26 = vpop.f32.mrf.mxu0 }
  0xd4   : > { %v1357_v29 = vadd.f32 %v1337_v19, %v1223_v25  ;;  %v1585_v4 = vpop.f32.mrf.mxu1 }
  0xd6   : > { %v1603_v11 = vadd.f32 %v1583_v61, %v1357_v29 }
  0xd7   : > { %v1071_v30 = vpop.f32.mrf.mxu2 }
  0xd8   : > { %v1205_v31 = vpop.f32.mrf.mxu3  ;;  %v1090_v9 = vadd.f32 %v1071_v30, %v831_v8 }
  0xda   : > { %v1224_v41 = vadd.f32 %v1205_v31, %v1090_v9 }
  0xdb   : > { %v1342_v32 = vpop.f32.mrf.mxu0 }
  0xdc   : > { %v1358_v18 = vadd.f32 %v1339_v26, %v1224_v41 }
  0xde   : > { %v1604_v21 = vadd.f32 %v1585_v4, %v1358_v18 }
  0xdf   : > { %v1074_v36 = vpop.f32.mrf.mxu2 }
  0xe0   : > { %v1208_v37 = vpop.f32.mrf.mxu3  ;;  %v1091_v38 = vadd.f32 %v1074_v36, %v834_v35 }
  0xe2   : > { %v1225_v39 = vadd.f32 %v1208_v37, %v1091_v38 }
  0xe3   : > { %v3694_v40 = vpop.f32.mrf.mxu0 }
  0xe4   : > { %v1359_v43 = vadd.f32 %v1342_v32, %v1225_v39 }
  0xe7   : > { %v1076_v44 = vpop.f32.mrf.mxu2 }
  0xe8   : > { %v1210_v45 = vpop.f32.mrf.mxu3  ;;  %v1092_v28 = vadd.f32 %v1076_v44, %v836_v24 }
  0xea   : > { %v1226_v34 = vadd.f32 %v1210_v45, %v1092_v28 }
  0xeb   : > { %v1347_v46 = vpop.f32.mrf.mxu0 }
  0xec   : > { %v1360_v42 = vadd.f32 %v3694_v40, %v1226_v34 }
  0xef   : > { %v1079_v48 = vpop.f32.mrf.mxu2 }
  0xf0   : > { %v1213_v49 = vpop.f32.mrf.mxu3  ;;  %v1093_v50 = vadd.f32 %v1079_v48, %v3664_v58  ;;  %v3117_v58 = vld [vmem:[%s3772_s8] sm:$0xff] }
  0xf1   : > { %2224 = vmatpush.bf16.msra.mxu1 %v3117_v58 }
  0xf2   : > { %v1227_v51 = vadd.f32 %v1213_v49, %v1093_v50 }
  0xf3   : > { %v3703_v52 = vpop.f32.mrf.mxu0 }
  0xf4   : > { %v3705_v54 = vadd.f32 %v1347_v46, %v1227_v51 }
  0xf7   : > { %v1081_v55 = vpop.f32.mrf.mxu2 }
  0xf8   : > { %v3707_v56 = vpop.f32.mrf.mxu3  ;;  %v1094_v45 = vadd.f32 %v1081_v55, %v3676_v6 }
  0xfa   : > { %v1228_v40 = vadd.f32 %v3707_v56, %v1094_v45 }
  0xfb   : > { %v1352_v60 = vpop.f32.mrf.mxu0 }
  0xff   : > { %v1084_v62 = vpop.f32.mrf.mxu2 }
 0x100   : > { %v1218_v63 = vpop.f32.mrf.mxu3  ;;  %v1095_v0 = vadd.f32 %v1084_v62, %v844_v12  ;;  %v1588_v12 = vpop.f32.mrf.mxu1 }
 0x101   : > { %v1605_v33 = vadd.f32 %v1588_v12, %v1359_v43 }
 0x102   : > { %v1229_v1 = vadd.f32 %v1218_v63, %v1095_v0 }
 0x103   : > { %v3715_v2 = vpop.f32.mrf.mxu0 }
 0x104   : > { %v3717_v3 = vadd.f32 %v1352_v60, %v1229_v1 }
 0x107   : > { %v3719_v5 = vpop.f32.mrf.mxu2 }
 0x108   : > { %v3721_v7 = vpop.f32.mrf.mxu3  ;;  %v1590_v29 = vpop.f32.mrf.mxu1  ;;  %v1096_v18 = vadd.f32 %v3719_v5, %v3683_v17 }
 0x109   : > { %v1606_v49 = vadd.f32 %v1590_v29, %v1360_v42 }
 0x10b   : > { %v2097_v10 = vpop.f32.mrf.mxu0 }
 0x10f   : > { %v1717_v14 = vpop.f32.mrf.mxu2 }
 0x110   : > { %v1851_v15 = vpop.f32.mrf.mxu3  ;;  %v1737_v16 = vadd.f32 %v1717_v14, %v1603_v11  ;;  %v1593_v44 = vpop.f32.mrf.mxu1  ;;  %v1362_v11 = vadd.f32 %v3703_v52, %v1228_v40  ;;  %v1230_v52 = vadd.f32 %v3721_v7, %v1096_v18 }
 0x111   : > { %v1607_v63 = vadd.f32 %v1593_v44, %v3705_v54 }
 0x112   : > { %v1871_v20 = vadd.f32 %v1851_v15, %v1737_v16 }
 0x113   : > { %v2099_v19 = vpop.f32.mrf.mxu0 }
 0x114   : > { %v2117_v25 = vadd.f32 %v2097_v10, %v1871_v20 }
 0x116   : > { %v2129_v26 = vadd.f32 %v3728_v59, %v2117_v25 }
 0x117   : > { %v1719_v22 = vpop.f32.mrf.mxu2 }
 0x118   : > { %v1853_v23 = vpop.f32.mrf.mxu3  ;;  %v1738_v27 = vadd.f32 %v1719_v22, %v1604_v21  ;;  %v2137_v37 = vmax.f32 %v2129_v26, 0.0  ;;  %v1595_v58 = vpop.f32.mrf.mxu1 }
 0x119   : > { %v1608_v41 = vadd.f32 %v1595_v58, %v1362_v11 }
 0x11a   : > { %v1872_v30 = vadd.f32 %v1853_v23, %v1738_v27 }
 0x11b   : > { %v2102_v31 = vpop.f32.mrf.mxu0 }
 0x11c   : > { %v2118_v32 = vadd.f32 %v2099_v19, %v1872_v30 }
 0x11e   : > { %v2130_v35 = vadd.f32 %v3728_v59, %v2118_v32 }
 0x11f   : > { %v1722_v36 = vpop.f32.mrf.mxu2 }
 0x120   : > { %v1856_v13 = vpop.f32.mrf.mxu3  ;;  %v2138_v38 = vmax.f32 %v2130_v35, 0.0  ;;  %v1739_v39 = vadd.f32 %v1722_v36, %v1605_v33  ;;  %v1598_v56 = vpop.f32.mrf.mxu1 }
 0x121   : > { %v1609_v22 = vadd.f32 %v1598_v56, %v3717_v3 }
 0x122   : > { %v2145_v46 = vpack.c.bf16 %v2138_v38, %v2137_v37  ;;  %v1873_v48 = vadd.f32 %v1856_v13, %v1739_v39 }
 0x123   : > { %v2104_v47 = vpop.f32.mrf.mxu0 }
 0x124   : > { %2225 = vmatmul.bf16.vlgmr.msra.gmra.mxu1 %v2145_v46  ;;  %v2119_v53 = vadd.f32 %v2102_v31, %v1873_v48  ;;  %v1364_v31 = vadd.f32 %v3715_v2, %v1230_v52  ;;  %v3166_v46 = vld [vmem:[%s3773_s9] ss:$0 sm:$0xff] }
 0x126   : > { %v2131_v62 = vadd.f32 %v3728_v59, %v2119_v53 }
 0x127   : > { %v1724_v50 = vpop.f32.mrf.mxu2 }
 0x128   : > { %v1858_v51 = vpop.f32.mrf.mxu3  ;;  %v1740_v43 = vadd.f32 %v1724_v50, %v1606_v49  ;;  %v2139_v9 = vmax.f32 %v2131_v62, 0.0  ;;  %v1600_v17 = vpop.f32.mrf.mxu1 }
 0x129   : > { %v1610_v32 = vadd.f32 %v1600_v17, %v1364_v31 }
 0x12a   : > { %v1874_v57 = vadd.f32 %v1858_v51, %v1740_v43 }
 0x12b   : > { %v2107_v61 = vpop.f32.mrf.mxu0 }
 0x12c   : > { %v2120_v60 = vadd.f32 %v2104_v47, %v1874_v57 }
 0x12e   : > { %v2132_v0 = vadd.f32 %v3728_v59, %v2120_v60 }
 0x12f   : > { %v1727_v1 = vpop.f32.mrf.mxu2 }
 0x130   : > { %v1861_v4 = vpop.f32.mrf.mxu3  ;;  %v1741_v8 = vadd.f32 %v1727_v1, %v1607_v63  ;;  %v2140_v10 = vmax.f32 %v2132_v0, 0.0 }
 0x132   : > { %v2146_v6 = vpack.c.bf16 %v2140_v10, %v2139_v9  ;;  %v1875_v55 = vadd.f32 %v1861_v4, %v1741_v8 }
 0x133   : > { %v2109_v14 = vpop.f32.mrf.mxu0 }
 0x134   : > { %2230 = vmatmul.bf16.gmra.mxu1 %v2146_v6  ;;  %v2121_v54 = vadd.f32 %v2107_v61, %v1875_v55 }
 0x136   : > { %v2133_v21 = vadd.f32 %v3728_v59, %v2121_v54 }
 0x137   : > { %v1729_v15 = vpop.f32.mrf.mxu2 }
 0x138   : > { %v1863_v12 = vpop.f32.mrf.mxu3  ;;  %v1742_v16 = vadd.f32 %v1729_v15, %v1608_v41  ;;  %v2141_v28 = vmax.f32 %v2133_v21, 0.0 }
 0x13a   : > { %v1876_v19 = vadd.f32 %v1863_v12, %v1742_v16 }
 0x13b   : > { %v2112_v30 = vpop.f32.mrf.mxu0 }
 0x13c   : > { %v2122_v20 = vadd.f32 %v2109_v14, %v1876_v19 }
 0x13e   : > { %v2134_v23 = vadd.f32 %v3728_v59, %v2122_v20 }
 0x13f   : > { %v1732_v24 = vpop.f32.mrf.mxu2 }
 0x140   : > { %v1866_v25 = vpop.f32.mrf.mxu3  ;;  %v1743_v27 = vadd.f32 %v1732_v24, %v1609_v22  ;;  %v2142_v29 = vmax.f32 %v2134_v23, 0.0 }
 0x142   : > { %v2147_v26 = vpack.c.bf16 %v2142_v29, %v2141_v28  ;;  %v1877_v5 = vadd.f32 %v1866_v25, %v1743_v27 }
 0x143   : > { %v2114_v36 = vpop.f32.mrf.mxu0 }
 0x144   : > { %2235 = vmatmul.bf16.gmra.mxu1 %v2147_v26  ;;  %v2123_v3 = vadd.f32 %v2112_v30, %v1877_v5 }
 0x146   : > { %v2135_v37 = vadd.f32 %v3728_v59, %v2123_v3 }
 0x147   : > { %v1734_v33 = vpop.f32.mrf.mxu2 }
 0x148   : > { %v1744_v34 = vadd.f32 %v1734_v33, %v1610_v32  ;;  %v1868_v7 = vpop.f32.mrf.mxu3  ;;  %v2143_v39 = vmax.f32 %v2135_v37, 0.0 }
 0x14a   : > { %v1878_v35 = vadd.f32 %v1868_v7, %v1744_v34 }
 0x14c   : > { %v2124_v13 = vadd.f32 %v2114_v36, %v1878_v35 }
 0x14e   : > { %v2136_v38 = vadd.f32 %v3728_v59, %v2124_v13 }
 0x150   : > { %v2144_v42 = vmax.f32 %v2136_v38, 0.0 }
 0x152   : > { %v2148_v2 = vpack.c.bf16 %v2144_v42, %v2143_v39 }
 0x154   : > { %2240 = vmatmul.bf16.gmra.mxu1 %v2148_v2 }
 0x1a1   : > { %v2226_v47 = vpop.f32.mrf.mxu1 }
 0x1a2   : > { %v2227_v44 = vadd.f32 %v3166_v46, %v2226_v47 }
 0x1a4   : > { %2246 = vst [vmem:[%s595_s30] sm:$0xff] %v2227_v44 }
 0x1a9   : > { %v2228_v48 = vpop.f32.mrf.mxu1 }
 0x1aa   : > { %v2229_v49 = vadd.f32 %v3166_v46, %v2228_v48 }
 0x1ac   : > { %2247 = vst [vmem:[%s595_s30 + $0x8] sm:$0xff] %v2229_v49 }
 0x1b1   : > { %v2231_v50 = vpop.f32.mrf.mxu1 }
 0x1b2   : > { %v2232_v59 = vadd.f32 %v3166_v46, %v2231_v50 }
 0x1b4   : > { %2248 = vst [vmem:[%s595_s30 + $0x10] sm:$0xff] %v2232_v59 }
 0x1b9   : > { %v2233_v51 = vpop.f32.mrf.mxu1 }
 0x1ba   : > { %v2234_v53 = vadd.f32 %v3166_v46, %v2233_v51 }
 0x1bc   : > { %2249 = vst [vmem:[%s595_s30 + $0x18] sm:$0xff] %v2234_v53 }
 0x1c1   : > { %v2236_v43 = vpop.f32.mrf.mxu1 }
 0x1c2   : > { %v2237_v45 = vadd.f32 %v3166_v46, %v2236_v43 }
 0x1c4   : > { %2250 = vst [vmem:[%s595_s30 + $0x20] sm:$0xff] %v2237_v45 }
 0x1c9   : > { %v2238_v57 = vpop.f32.mrf.mxu1 }
 0x1ca   : > { %v2239_v60 = vadd.f32 %v3166_v46, %v2238_v57 }
 0x1cc   : > { %2251 = vst [vmem:[%s595_s30 + $0x28] sm:$0xff] %v2239_v60 }
 0x1d1   : > { %v2241_v61 = vpop.f32.mrf.mxu1 }
 0x1d2   : > { %v2242_v62 = vadd.f32 %v3166_v46, %v2241_v61 }
 0x1d4   : > { %2252 = vst [vmem:[%s595_s30 + $0x30] sm:$0xff] %v2242_v62 }
 0x1d9   : > { %v2243_v63 = vpop.f32.mrf.mxu1 }
 0x1da   : > { %v2244_v40 = vadd.f32 %v3166_v46, %v2243_v63 }
 0x1dc   : > { %2253 = vst [vmem:[%s595_s30 + $0x38] sm:$0xff] %v2244_v40 }
 0x1dd PF: > { %s20_s15 = sadd.s32 1, %s3189_s15   ;;  %s3777_s13 = smov %s3185_s14 }
 0x1de   : > { %p17_p5 = scmp.ge.s32.totalorder %s20_s15, 4   ;;  %s3778_s14 = smov %s3780_s16 }
 0x1e0   :  { %19 = sbr.rel (!%p17_p5) target bundleno = 2 (0x2), region = 113 }

</bundles_post_ra>
